<compile_context>
chip_gen: v7x
topology: tpu7x:2x2x1
jax: 0.10.0
libtpu: 0.0.40
codegen_flags: <defaults>
</compile_context>

<pallas_src>
from functools import partial

import jax
import jax.numpy as jnp
import numpy as np
from jax.experimental import pallas as pl
from jax.experimental.pallas import tpu as pltpu

EPS = 1e-6
LANE = 128


def _round_up(n, m):
    return ((n + m - 1) // m) * m


def _pad_axis(a, target, axis):
    pad = target - a.shape[axis]
    if pad == 0:
        return a
    widths = [(0, 0)] * a.ndim
    widths[axis] = (0, pad)
    return jnp.pad(a, widths)


def _first_tcn_kernel(K, M_real,
                      prelu_ref,                     # SMEM (2,): [a1, a2]
                      x_ref, rb_ref,                 # (1,T,Cxp) f32, (1,1,Mp) f32
                      w1x_ref,                       # (Cxp,Mp)  f32|bf16
                      g1_ref, be1_ref,               # (1,Mp) f32
                      wd_ref, bd_ref,                # (K,Mp), (1,Mp) f32
                      g2_ref, be2_ref,               # (Mp,1), (Mp,1) f32 columns
                      w2_ref, b2_ref,                # (Mp,Coutp) f32|bf16, (1,Coutp)
                      o_ref,                         # (1,T,Coutp) f32
                      acc_ref):                      # VMEM scratch (T, Mp) f32
    x = x_ref[0]                                     # (T, Cxp), f32 (residual path)
    T = x.shape[0]
    inv_n = 1.0 / float(T * M_real)                  # GLN uses the REAL channel count
    a1 = prelu_ref[0]
    a2 = prelu_ref[1]

    # ---- 1x1 conv #1 over concat([x, ref.repeat(T)], channels) -------------
    # speaker-ref part + bias were folded into rb in the wrapper; MXU operands
    # use the (possibly bf16) weight dtype, accumulation stays f32.
    y = jnp.dot(x.astype(w1x_ref.dtype), w1x_ref[...],
                preferred_element_type=jnp.float32)
    y = y + rb_ref[0]                                # (1, Mp) broadcast over T

    # ---- PReLU #1 (single shared parameter, torch default) -----------------
    y = jnp.where(y > 0, y, a1 * y)

    # ---- GLN #1: statistics only (affine folded into the depthwise taps) ---
    mean1 = jnp.sum(y) * inv_n
    var1 = jnp.sum(y * y) * inv_n - mean1 * mean1
    scale1 = g1_ref[...] * jax.lax.rsqrt(var1 + EPS)          # (1, Mp), EUP rsqrt
    shift1 = be1_ref[...] - mean1 * scale1

    # ---- depthwise Conv1d (kernel K, dilation 1, zero padding (K-1)//2) ----
    #   out[t] = bd + sum_k wd[k]*(scale1*y[t+k-pad] + shift1)   (zero-padded)
    # => taps' = wd*scale1, bias' = bd + shift1*sum_k wd[k]; accumulate the
    # rolls unmasked, then correct only the 2*pad boundary rows in scratch.
    pad = (K - 1) // 2
    wd = wd_ref[...]                                  # (K, Mp) raw taps, hoisted
    wd_s = wd * scale1                                # GLN1-scaled taps
    bias_dw = bd_ref[...] + shift1 * jnp.sum(wd, axis=0, keepdims=True)

    acc = wd_s[pad:pad + 1, :] * y                    # centre tap
    for k in range(K):                                # static unroll, small K
        d = k - pad
        if d == 0:
            continue
        acc = acc + wd_s[k:k + 1, :] * pltpu.roll(y, shift=(-d) % T, axis=0)
    acc_ref[...] = acc + bias_dw

    # boundary fix-up: subtract the wrapped (circular) contributions the
    # unmasked rolls brought in -- touches only the first/last `pad` rows.
    if pad > 0:
        for k in range(K):
            d = k - pad
            wk = wd[k:k + 1, :]
            if d < 0:
                nd = -d
                wrong = wk * (scale1 * y[T - nd:T, :] + shift1)     # (nd, Mp)
                acc_ref[0:nd, :] = acc_ref[0:nd, :] - wrong
            elif d > 0:
                wrong = wk * (scale1 * y[0:d, :] + shift1)          # (d, Mp)
                acc_ref[T - d:T, :] = acc_ref[T - d:T, :] - wrong
    acc = acc_ref[...]

    # ---- PReLU #2 -----------------------------------------------------------
    acc = jnp.where(acc > 0, acc, a2 * acc)

    # ---- GLN #2: statistics only (affine folded into w2 / b2) --------------
    mean2 = jnp.sum(acc) * inv_n
    var2 = jnp.sum(acc * acc) * inv_n - mean2 * mean2
    scale2 = g2_ref[...] * jax.lax.rsqrt(var2 + EPS)          # (Mp, 1) column
    shift2 = be2_ref[...] - mean2 * scale2                    # (Mp, 1) column

    # ---- 1x1 conv #2 with GLN2 folded in, + residual connection ------------
    #   (acc*scale2 + shift2) @ w2 + b2 == acc @ (w2*scale2) + (shift2.T@w2 + b2)
    w2f = w2_ref[...].astype(jnp.float32)                     # (Mp, Coutp) small
    w2s = (w2f * scale2).astype(w2_ref.dtype)                 # row-scaled weights
    b2e = b2_ref[...] + jnp.sum(w2f * shift2, axis=0, keepdims=True)

    z = jnp.dot(acc.astype(w2_ref.dtype), w2s,
                preferred_element_type=jnp.float32)
    o_ref[0] = (z + b2e + x).astype(o_ref.dtype)


def _vmem_limit_bytes(T, Cxp, Mp, Coutp, K, w_itemsize):
    """Generation-aware VMEM budget from the actually-resident slabs."""
    f32 = 4
    io_bytes = 2 * f32 * T * (Cxp + Coutp) + 2 * f32 * Mp      # dbl-buffered I/O
    temp_bytes = 5 * f32 * T * Mp                               # y, acc scratch, roll/cast temps
    weight_bytes = 2 * (w_itemsize * (Cxp * Mp + Mp * Coutp)
                        + f32 * ((K + 6) * Mp + 2 * Coutp))
    need = int(1.25 * (io_bytes + temp_bytes + weight_bytes))
    try:
        cap = int(pltpu.get_tpu_info().vmem_capacity_bytes)     # 128 MiB v5e/v6e, 64 MiB v7x
    except Exception:
        cap = 64 << 20
    cap = max(cap - (16 << 20), (cap * 7) // 8)                 # leave compiler headroom
    return int(min(max(need, 16 << 20), cap))


def first_tcn_block(x_btc, ref_b1c, p, K, matmul_dtype=jnp.bfloat16):
    """x_btc: (B, T, Cx) f32, ref_b1c: (B, 1, Cref) f32 (channels-last).

    matmul_dtype: operand dtype of the two MXU matmuls (bf16 by default for
    v5e/v6e/v7x throughput; pass jnp.float32 for strict f32 parity).
    """
    B, T, Cx = x_btc.shape
    M = p["b1"].shape[1]
    Cout = p["b2"].shape[1]
    assert K % 2 == 1, "PyTorch same-length padding in this block needs odd K"
    assert T >= K, "time axis must cover the depthwise kernel"
    assert Cout == Cx, "residual add requires out_channels == input channels"

    Mp = _round_up(M, LANE)
    Cxp = _round_up(Cx, LANE)
    Coutp = _round_up(Cout, LANE)        # == Cxp

    # ---- lane-dense zero padding (padded lanes stay exactly 0 in-kernel) ----
    xp = _pad_axis(x_btc, Cxp, axis=2)

    # fold the speaker-reference 1x1-conv contribution + bias into a per-batch
    # bias row (removes a degenerate 1-row MXU matmul + 2 inputs per step)
    ref_bias = jnp.einsum("brc,cm->brm", ref_b1c, p["w1r"]) + p["b1"][None]
    ref_bias = _pad_axis(ref_bias, Mp, axis=2)                    # (B, 1, Mp) f32

    w1x = _pad_axis(_pad_axis(p["w1x"], Cxp, 0), Mp, 1).astype(matmul_dtype)
    g1 = _pad_axis(p["g1"], Mp, 1)
    be1 = _pad_axis(p["be1"], Mp, 1)
    wd = _pad_axis(p["wd"], Mp, 1)
    bd = _pad_axis(p["bd"], Mp, 1)
    # gamma2/beta2 as (Mp,1) columns so the GLN2 affine folds into w2's rows
    # without an in-kernel transpose.
    g2c = _pad_axis(p["g2"].T, Mp, 0)
    be2c = _pad_axis(p["be2"].T, Mp, 0)
    w2 = _pad_axis(_pad_axis(p["w2"], Mp, 0), Coutp, 1).astype(matmul_dtype)
    b2 = _pad_axis(p["b2"], Coutp, 1)
    prelu = jnp.concatenate([p["a1"].reshape(-1), p["a2"].reshape(-1)])  # (2,)

    vmem_limit = _vmem_limit_bytes(T, Cxp, Mp, Coutp, K,
                                   jnp.dtype(matmul_dtype).itemsize)

    def make_call(single_buffer_weights):
        if single_buffer_weights:
            # grid-invariant operands need no double buffer -> frees VMEM
            def wspec(shape):
                return pl.BlockSpec(shape, lambda b: (0, 0),
                                    pipeline_mode=pl.Buffered(1))
        else:
            def wspec(shape):
                return pl.BlockSpec(shape, lambda b: (0, 0))
        return pl.pallas_call(
            partial(_first_tcn_kernel, K, M),
            out_shape=jax.ShapeDtypeStruct((B, T, Coutp), jnp.float32),
            grid_spec=pltpu.PrefetchScalarGridSpec(
                num_scalar_prefetch=0,
                grid=(B,),
                in_specs=[
                    pl.BlockSpec(memory_space=pltpu.MemorySpace.SMEM),   # PReLU scalars
                    pl.BlockSpec((1, T, Cxp), lambda b: (b, 0, 0)),      # x
                    pl.BlockSpec((1, 1, Mp), lambda b: (b, 0, 0)),       # ref bias
                    wspec((Cxp, Mp)),                                    # w1 (x part)
                    wspec((1, Mp)),                                      # gamma1
                    wspec((1, Mp)),                                      # beta1
                    wspec((K, Mp)),                                      # depthwise taps
                    wspec((1, Mp)),                                      # depthwise bias
                    wspec((Mp, 1)),                                      # gamma2 (column)
                    wspec((Mp, 1)),                                      # beta2 (column)
                    wspec((Mp, Coutp)),                                  # w2
                    wspec((1, Coutp)),                                   # b2
                ],
                out_specs=pl.BlockSpec((1, T, Coutp), lambda b: (b, 0, 0)),
                scratch_shapes=[pltpu.VMEM((T, Mp), jnp.float32)],
            ),
            compiler_params=pltpu.CompilerParams(
                dimension_semantics=("parallel",),
                vmem_limit_bytes=vmem_limit),
        )

    args = (prelu, xp, ref_bias, w1x, g1, be1, wd, bd, g2c, be2c, w2, b2)
    try:
        out = jax.block_until_ready(make_call(True)(*args))
    except Exception:
        # pipeline_mode=pl.Buffered(1) not supported by this jax/libtpu combo:
        # fall back to default double-buffered weight blocks (same semantics).
        out = make_call(False)(*args)

    return out[:, :, :Cout]


def reference_forward(x, r, p, K):
    """Pure-JAX reference of FirstTCNBlock.forward in (B, T, C) layout."""
    B, T, Cx = x.shape
    rrep = jnp.broadcast_to(r, (B, T, r.shape[2]))               # .repeat(1,1,T)
    y = (jnp.einsum("btc,cm->btm", x, p["w1x"])
         + jnp.einsum("btc,cm->btm", rrep, p["w1r"]) + p["b1"][None])
    y = jnp.where(y > 0, y, p["a1"][0, 0] * y)
    mean = jnp.mean(y, axis=(1, 2), keepdims=True)
    var = jnp.mean((y - mean) ** 2, axis=(1, 2), keepdims=True)
    y = (y - mean) / jnp.sqrt(var + EPS)
    y = p["g1"][None] * y + p["be1"][None]
    pad = (K - 1) // 2
    yp = jnp.pad(y, ((0, 0), (pad, pad), (0, 0)))
    acc = sum(p["wd"][k][None, None, :] * yp[:, k:k + T, :] for k in range(K))
    acc = acc + p["bd"][None]
    acc = jnp.where(acc > 0, acc, p["a2"][0, 0] * acc)
    mean2 = jnp.mean(acc, axis=(1, 2), keepdims=True)
    var2 = jnp.mean((acc - mean2) ** 2, axis=(1, 2), keepdims=True)
    acc = (acc - mean2) / jnp.sqrt(var2 + EPS)
    acc = p["g2"][None] * acc + p["be2"][None]
    z = jnp.einsum("btm,mn->btn", acc, p["w2"]) + p["b2"][None]
    return z + x


if __name__ == "__main__":
    # Small shapes: input NCW = (B=2, Cx=16, T=16), reference = (B=2, Cref=8, 1)
    # FirstTCNBlock(in_channels=Cx+Cref=24, middle_channels=M=32,
    #               out_channels=Cx=16, kernel_size=3)
    B, T, Cx, Cref, M, K = 2, 16, 16, 8, 32, 3
    Cout = Cx  # residual add requires out_channels == input channels

    key = jax.random.PRNGKey(0)
    ks = jax.random.split(key, 10)

    params = {
        "w1x": 0.1 * jax.random.normal(ks[0], (Cx, M), jnp.float32),
        "w1r": 0.1 * jax.random.normal(ks[1], (Cref, M), jnp.float32),
        "b1":  0.1 * jax.random.normal(ks[2], (1, M), jnp.float32),
        "a1":  jnp.full((1, 1), 0.25, jnp.float32),          # torch PReLU default
        "g1":  jnp.ones((1, M), jnp.float32),                 # GLN gamma init
        "be1": jnp.zeros((1, M), jnp.float32),                # GLN beta init
        "wd":  0.1 * jax.random.normal(ks[3], (K, M), jnp.float32),
        "bd":  0.1 * jax.random.normal(ks[4], (1, M), jnp.float32),
        "a2":  jnp.full((1, 1), 0.25, jnp.float32),
        "g2":  jnp.ones((1, M), jnp.float32),
        "be2": jnp.zeros((1, M), jnp.float32),
        "w2":  0.1 * jax.random.normal(ks[5], (M, Cout), jnp.float32),
        "b2":  0.1 * jax.random.normal(ks[6], (1, Cout), jnp.float32),
    }

    # inputs (built directly in channels-last layout; the NCW equivalents of
    # the PyTorch module would be x.transpose(0, 2, 1), ref.transpose(0, 2, 1))
    x = jax.random.normal(ks[7], (B, T, Cx), jnp.float32)
    ref = jax.random.normal(ks[8], (B, 1, Cref), jnp.float32)

    expected = reference_forward(x, ref, params, K)

    # strict f32 parity with the PyTorch module
    out_f32 = jax.block_until_ready(
        first_tcn_block(x, ref, params, K, matmul_dtype=jnp.float32))
    np.testing.assert_allclose(np.asarray(out_f32), np.asarray(expected),
                               rtol=1e-4, atol=1e-4)

    # production configuration: bf16 MXU operands (looser tolerance expected)
    out_bf16 = jax.block_until_ready(
        first_tcn_block(x, ref, params, K, matmul_dtype=jnp.bfloat16))
    np.testing.assert_allclose(np.asarray(out_bf16), np.asarray(expected),
                               rtol=5e-2, atol=5e-2)

    print("KERNEL_OK")
</pallas_src>

<mosaic_0001>
module attributes {stable_mosaic.version = 11 : i64} {
  func.func @_first_tcn_kernel(%arg0: i32, %arg1: memref<2xf32, #tpu.memory_space<smem>>, %arg2: memref<1x16x128xf32, #tpu.memory_space<vmem>>, %arg3: memref<1x1x128xf32, #tpu.memory_space<vmem>>, %arg4: memref<128x128xf32, #tpu.memory_space<vmem>>, %arg5: memref<1x128xf32, #tpu.memory_space<vmem>>, %arg6: memref<1x128xf32, #tpu.memory_space<vmem>>, %arg7: memref<3x128xf32, #tpu.memory_space<vmem>>, %arg8: memref<1x128xf32, #tpu.memory_space<vmem>>, %arg9: memref<128x1xf32, #tpu.memory_space<vmem>>, %arg10: memref<128x1xf32, #tpu.memory_space<vmem>>, %arg11: memref<128x128xf32, #tpu.memory_space<vmem>>, %arg12: memref<1x128xf32, #tpu.memory_space<vmem>>, %arg13: memref<1x16x128xf32, #tpu.memory_space<vmem>>, %arg14: memref<16x128xf32, #tpu.memory_space<vmem>>) attributes {dimension_semantics = [#tpu.dimension_semantics<parallel>], iteration_bounds = array<i64: 2>, scalar_prefetch = 0 : i64, scratch_operands = 1 : i64, tpu.core_type = #tpu.core_type<tc>, window_params = [{transform_indices = @transform_0, window_bounds = array<i64: 2>}, {transform_indices = @transform_1, window_bounds = array<i64: 1, 16, 128>}, {transform_indices = @transform_2, window_bounds = array<i64: 1, 1, 128>}, {pipeline_mode = #tpu.pipeline_mode<synchronous>, transform_indices = @transform_3, window_bounds = array<i64: 128, 128>}, {pipeline_mode = #tpu.pipeline_mode<synchronous>, transform_indices = @transform_4, window_bounds = array<i64: 1, 128>}, {pipeline_mode = #tpu.pipeline_mode<synchronous>, transform_indices = @transform_5, window_bounds = array<i64: 1, 128>}, {pipeline_mode = #tpu.pipeline_mode<synchronous>, transform_indices = @transform_6, window_bounds = array<i64: 3, 128>}, {pipeline_mode = #tpu.pipeline_mode<synchronous>, transform_indices = @transform_7, window_bounds = array<i64: 1, 128>}, {pipeline_mode = #tpu.pipeline_mode<synchronous>, transform_indices = @transform_8, window_bounds = array<i64: 128, 1>}, {pipeline_mode = #tpu.pipeline_mode<synchronous>, transform_indices = @transform_9, window_bounds = array<i64: 128, 1>}, {pipeline_mode = #tpu.pipeline_mode<synchronous>, transform_indices = @transform_10, window_bounds = array<i64: 128, 128>}, {pipeline_mode = #tpu.pipeline_mode<synchronous>, transform_indices = @transform_11, window_bounds = array<i64: 1, 128>}, {transform_indices = @transform_12, window_bounds = array<i64: 1, 16, 128>}]} {
    %c0 = arith.constant 0 : index
    %c0_0 = arith.constant 0 : index
    %c0_1 = arith.constant 0 : index
    %0 = vector.load %arg2[%c0, %c0_0, %c0_1] : memref<1x16x128xf32, #tpu.memory_space<vmem>>, vector<1x16x128xf32>
    %1 = vector.shape_cast %0 : vector<1x16x128xf32> to vector<16x128xf32>
    %c0_2 = arith.constant 0 : index
    %2 = memref.load %arg1[%c0_2] : memref<2xf32, #tpu.memory_space<smem>>
    %c1 = arith.constant 1 : index
    %3 = memref.load %arg1[%c1] : memref<2xf32, #tpu.memory_space<smem>>
    %c0_3 = arith.constant 0 : index
    %c0_4 = arith.constant 0 : index
    %4 = vector.load %arg4[%c0_3, %c0_4] : memref<128x128xf32, #tpu.memory_space<vmem>>, vector<128x128xf32>
    %cst = arith.constant dense<0.000000e+00> : vector<16x128xf32>
    %5 = tpu.matmul %1, %4, %cst {dimension_numbers = #tpu.dot_dimension_numbers<[1], [0], [0], [1], [0, 0, 1, 1], [], []>} : vector<16x128xf32>, vector<128x128xf32>, vector<16x128xf32> -> vector<16x128xf32>
    %c0_5 = arith.constant 0 : index
    %c0_6 = arith.constant 0 : index
    %c0_7 = arith.constant 0 : index
    %6 = vector.load %arg3[%c0_5, %c0_6, %c0_7] : memref<1x1x128xf32, #tpu.memory_space<vmem>>, vector<1x1x128xf32>
    %7 = vector.shape_cast %6 : vector<1x1x128xf32> to vector<1x128xf32>
    %8 = vector.broadcast %7 : vector<1x128xf32> to vector<16x128xf32>
    %9 = arith.addf %5, %8 : vector<16x128xf32>
    %cst_8 = arith.constant 0.000000e+00 : f32
    %10 = vector.broadcast %cst_8 : f32 to vector<16x128xf32>
    %11 = arith.cmpf ogt, %9, %10 : vector<16x128xf32>
    %12 = vector.broadcast %2 : f32 to vector<16x128xf32>
    %13 = arith.mulf %12, %9 : vector<16x128xf32>
    %14 = arith.select %11, %9, %13 : vector<16x128xi1>, vector<16x128xf32>
    %15 = vector.shape_cast %14 : vector<16x128xf32> to vector<1x16x128xf32>
    %cst_9 = arith.constant dense<0.000000e+00> : vector<1xf32>
    %16 = vector.multi_reduction <add>, %15, %cst_9 [1, 2] : vector<1x16x128xf32> to vector<1xf32>
    %17 = vector.shape_cast %16 : vector<1xf32> to vector<1x1x1xf32>
    %18 = vector.extract %17[0, 0, 0] : f32 from vector<1x1x1xf32>
    %cst_10 = arith.constant 0.001953125 : f32
    %19 = arith.mulf %18, %cst_10 : f32
    %20 = arith.mulf %14, %14 : vector<16x128xf32>
    %21 = vector.shape_cast %20 : vector<16x128xf32> to vector<1x16x128xf32>
    %cst_11 = arith.constant dense<0.000000e+00> : vector<1xf32>
    %22 = vector.multi_reduction <add>, %21, %cst_11 [1, 2] : vector<1x16x128xf32> to vector<1xf32>
    %23 = vector.shape_cast %22 : vector<1xf32> to vector<1x1x1xf32>
    %24 = vector.extract %23[0, 0, 0] : f32 from vector<1x1x1xf32>
    %cst_12 = arith.constant 0.001953125 : f32
    %25 = arith.mulf %24, %cst_12 : f32
    %26 = arith.mulf %19, %19 : f32
    %27 = arith.subf %25, %26 : f32
    %c0_13 = arith.constant 0 : index
    %c0_14 = arith.constant 0 : index
    %28 = vector.load %arg5[%c0_13, %c0_14] : memref<1x128xf32, #tpu.memory_space<vmem>>, vector<1x128xf32>
    %cst_15 = arith.constant 9.99999997E-7 : f32
    %29 = arith.addf %27, %cst_15 : f32
    %30 = math.rsqrt %29 : f32
    %31 = vector.broadcast %30 : f32 to vector<1x128xf32>
    %32 = arith.mulf %28, %31 : vector<1x128xf32>
    %c0_16 = arith.constant 0 : index
    %c0_17 = arith.constant 0 : index
    %33 = vector.load %arg6[%c0_16, %c0_17] : memref<1x128xf32, #tpu.memory_space<vmem>>, vector<1x128xf32>
    %34 = vector.broadcast %19 : f32 to vector<1x128xf32>
    %35 = arith.mulf %34, %32 : vector<1x128xf32>
    %36 = arith.subf %33, %35 : vector<1x128xf32>
    %c0_18 = arith.constant 0 : index
    %c0_19 = arith.constant 0 : index
    %37 = vector.load %arg7[%c0_18, %c0_19] : memref<3x128xf32, #tpu.memory_space<vmem>>, vector<3x128xf32>
    %38 = vector.broadcast %32 : vector<1x128xf32> to vector<3x128xf32>
    %39 = arith.mulf %37, %38 : vector<3x128xf32>
    %c0_20 = arith.constant 0 : index
    %c0_21 = arith.constant 0 : index
    %40 = vector.load %arg8[%c0_20, %c0_21] : memref<1x128xf32, #tpu.memory_space<vmem>>, vector<1x128xf32>
    %cst_22 = arith.constant dense<0.000000e+00> : vector<128xf32>
    %41 = vector.multi_reduction <add>, %37, %cst_22 [0] : vector<3x128xf32> to vector<128xf32>
    %42 = vector.shape_cast %41 : vector<128xf32> to vector<1x128xf32>
    %43 = arith.mulf %36, %42 : vector<1x128xf32>
    %44 = arith.addf %40, %43 : vector<1x128xf32>
    %45 = vector.extract_strided_slice %39 {offsets = [1, 0], sizes = [1, 128], strides = [1, 1]} : vector<3x128xf32> to vector<1x128xf32>
    %46 = vector.broadcast %45 : vector<1x128xf32> to vector<16x128xf32>
    %47 = arith.mulf %46, %14 : vector<16x128xf32>
    %48 = vector.extract_strided_slice %39 {offsets = [0, 0], sizes = [1, 128], strides = [1, 1]} : vector<3x128xf32> to vector<1x128xf32>
    %c1_i32 = arith.constant 1 : i32
    %49 = tpu.dynamic_rotate %14 by %c1_i32 dim 0 : vector<16x128xf32>, i32 -> vector<16x128xf32>
    %50 = vector.broadcast %48 : vector<1x128xf32> to vector<16x128xf32>
    %51 = arith.mulf %50, %49 : vector<16x128xf32>
    %52 = arith.addf %47, %51 : vector<16x128xf32>
    %53 = vector.extract_strided_slice %39 {offsets = [2, 0], sizes = [1, 128], strides = [1, 1]} : vector<3x128xf32> to vector<1x128xf32>
    %c15_i32 = arith.constant 15 : i32
    %54 = tpu.dynamic_rotate %14 by %c15_i32 dim 0 : vector<16x128xf32>, i32 -> vector<16x128xf32>
    %55 = vector.broadcast %53 : vector<1x128xf32> to vector<16x128xf32>
    %56 = arith.mulf %55, %54 : vector<16x128xf32>
    %57 = arith.addf %52, %56 : vector<16x128xf32>
    %58 = vector.broadcast %44 : vector<1x128xf32> to vector<16x128xf32>
    %59 = arith.addf %57, %58 : vector<16x128xf32>
    %c0_23 = arith.constant 0 : index
    %c0_24 = arith.constant 0 : index
    %60 = vector.load %arg14[%c0_23, %c0_24] : memref<16x128xf32, #tpu.memory_space<vmem>>, vector<16x128xf32>
    tpu.vector_store %arg14[%c0_23, %c0_24], %59 {strides = array<i32>} : memref<16x128xf32, #tpu.memory_space<vmem>>, vector<16x128xf32>,
    %61 = vector.extract_strided_slice %37 {offsets = [0, 0], sizes = [1, 128], strides = [1, 1]} : vector<3x128xf32> to vector<1x128xf32>
    %62 = vector.extract_strided_slice %14 {offsets = [15, 0], sizes = [1, 128], strides = [1, 1]} : vector<16x128xf32> to vector<1x128xf32>
    %63 = arith.mulf %32, %62 : vector<1x128xf32>
    %64 = arith.addf %63, %36 : vector<1x128xf32>
    %65 = arith.mulf %61, %64 : vector<1x128xf32>
    %c0_25 = arith.constant 0 : index
    %c0_26 = arith.constant 0 : index
    %66 = vector.load %arg14[%c0_25, %c0_26] : memref<16x128xf32, #tpu.memory_space<vmem>>, vector<1x128xf32>
    %67 = arith.subf %66, %65 : vector<1x128xf32>
    %c0_27 = arith.constant 0 : index
    %c0_28 = arith.constant 0 : index
    %68 = vector.load %arg14[%c0_27, %c0_28] : memref<16x128xf32, #tpu.memory_space<vmem>>, vector<1x128xf32>
    tpu.vector_store %arg14[%c0_27, %c0_28], %67 {strides = array<i32>} : memref<16x128xf32, #tpu.memory_space<vmem>>, vector<1x128xf32>,
    %69 = vector.extract_strided_slice %37 {offsets = [2, 0], sizes = [1, 128], strides = [1, 1]} : vector<3x128xf32> to vector<1x128xf32>
    %70 = vector.extract_strided_slice %14 {offsets = [0, 0], sizes = [1, 128], strides = [1, 1]} : vector<16x128xf32> to vector<1x128xf32>
    %71 = arith.mulf %32, %70 : vector<1x128xf32>
    %72 = arith.addf %71, %36 : vector<1x128xf32>
    %73 = arith.mulf %69, %72 : vector<1x128xf32>
    %c15 = arith.constant 15 : index
    %c0_29 = arith.constant 0 : index
    %74 = vector.load %arg14[%c15, %c0_29] : memref<16x128xf32, #tpu.memory_space<vmem>>, vector<1x128xf32>
    %75 = arith.subf %74, %73 : vector<1x128xf32>
    %c15_30 = arith.constant 15 : index
    %c0_31 = arith.constant 0 : index
    %76 = vector.load %arg14[%c15_30, %c0_31] : memref<16x128xf32, #tpu.memory_space<vmem>>, vector<1x128xf32>
    tpu.vector_store %arg14[%c15_30, %c0_31], %75 {strides = array<i32>} : memref<16x128xf32, #tpu.memory_space<vmem>>, vector<1x128xf32>,
    %c0_32 = arith.constant 0 : index
    %c0_33 = arith.constant 0 : index
    %77 = vector.load %arg14[%c0_32, %c0_33] : memref<16x128xf32, #tpu.memory_space<vmem>>, vector<16x128xf32>
    %cst_34 = arith.constant 0.000000e+00 : f32
    %78 = vector.broadcast %cst_34 : f32 to vector<16x128xf32>
    %79 = arith.cmpf ogt, %77, %78 : vector<16x128xf32>
    %80 = vector.broadcast %3 : f32 to vector<16x128xf32>
    %81 = arith.mulf %80, %77 : vector<16x128xf32>
    %82 = arith.select %79, %77, %81 : vector<16x128xi1>, vector<16x128xf32>
    %83 = vector.shape_cast %82 : vector<16x128xf32> to vector<1x16x128xf32>
    %cst_35 = arith.constant dense<0.000000e+00> : vector<1xf32>
    %84 = vector.multi_reduction <add>, %83, %cst_35 [1, 2] : vector<1x16x128xf32> to vector<1xf32>
    %85 = vector.shape_cast %84 : vector<1xf32> to vector<1x1x1xf32>
    %86 = vector.extract %85[0, 0, 0] : f32 from vector<1x1x1xf32>
    %cst_36 = arith.constant 0.001953125 : f32
    %87 = arith.mulf %86, %cst_36 : f32
    %88 = arith.mulf %82, %82 : vector<16x128xf32>
    %89 = vector.shape_cast %88 : vector<16x128xf32> to vector<1x16x128xf32>
    %cst_37 = arith.constant dense<0.000000e+00> : vector<1xf32>
    %90 = vector.multi_reduction <add>, %89, %cst_37 [1, 2] : vector<1x16x128xf32> to vector<1xf32>
    %91 = vector.shape_cast %90 : vector<1xf32> to vector<1x1x1xf32>
    %92 = vector.extract %91[0, 0, 0] : f32 from vector<1x1x1xf32>
    %cst_38 = arith.constant 0.001953125 : f32
    %93 = arith.mulf %92, %cst_38 : f32
    %94 = arith.mulf %87, %87 : f32
    %95 = arith.subf %93, %94 : f32
    %c0_39 = arith.constant 0 : index
    %c0_40 = arith.constant 0 : index
    %96 = vector.load %arg9[%c0_39, %c0_40] : memref<128x1xf32, #tpu.memory_space<vmem>>, vector<128x1xf32>
    %cst_41 = arith.constant 9.99999997E-7 : f32
    %97 = arith.addf %95, %cst_41 : f32
    %98 = math.rsqrt %97 : f32
    %99 = vector.broadcast %98 : f32 to vector<128x1xf32>
    %100 = arith.mulf %96, %99 : vector<128x1xf32>
    %c0_42 = arith.constant 0 : index
    %c0_43 = arith.constant 0 : index
    %101 = vector.load %arg10[%c0_42, %c0_43] : memref<128x1xf32, #tpu.memory_space<vmem>>, vector<128x1xf32>
    %102 = vector.broadcast %87 : f32 to vector<128x1xf32>
    %103 = arith.mulf %102, %100 : vector<128x1xf32>
    %104 = arith.subf %101, %103 : vector<128x1xf32>
    %c0_44 = arith.constant 0 : index
    %c0_45 = arith.constant 0 : index
    %105 = vector.load %arg11[%c0_44, %c0_45] : memref<128x128xf32, #tpu.memory_space<vmem>>, vector<128x128xf32>
    %106 = vector.broadcast %100 : vector<128x1xf32> to vector<128x128xf32>
    %107 = arith.mulf %105, %106 : vector<128x128xf32>
    %c0_46 = arith.constant 0 : index
    %c0_47 = arith.constant 0 : index
    %108 = vector.load %arg12[%c0_46, %c0_47] : memref<1x128xf32, #tpu.memory_space<vmem>>, vector<1x128xf32>
    %109 = vector.broadcast %104 : vector<128x1xf32> to vector<128x128xf32>
    %110 = arith.mulf %105, %109 : vector<128x128xf32>
    %cst_48 = arith.constant dense<0.000000e+00> : vector<128xf32>
    %111 = vector.multi_reduction <add>, %110, %cst_48 [0] : vector<128x128xf32> to vector<128xf32>
    %112 = vector.shape_cast %111 : vector<128xf32> to vector<1x128xf32>
    %113 = arith.addf %108, %112 : vector<1x128xf32>
    %cst_49 = arith.constant dense<0.000000e+00> : vector<16x128xf32>
    %114 = tpu.matmul %82, %107, %cst_49 {dimension_numbers = #tpu.dot_dimension_numbers<[1], [0], [0], [1], [0, 0, 1, 1], [], []>} : vector<16x128xf32>, vector<128x128xf32>, vector<16x128xf32> -> vector<16x128xf32>
    %115 = vector.broadcast %113 : vector<1x128xf32> to vector<16x128xf32>
    %116 = arith.addf %114, %115 : vector<16x128xf32>
    %117 = arith.addf %116, %1 : vector<16x128xf32>
    %c0_50 = arith.constant 0 : index
    %c0_51 = arith.constant 0 : index
    %c0_52 = arith.constant 0 : index
    %118 = vector.load %arg13[%c0_50, %c0_51, %c0_52] : memref<1x16x128xf32, #tpu.memory_space<vmem>>, vector<1x16x128xf32>
    %119 = vector.shape_cast %118 : vector<1x16x128xf32> to vector<16x128xf32>
    %120 = vector.shape_cast %117 : vector<16x128xf32> to vector<1x16x128xf32>
    tpu.vector_store %arg13[%c0_50, %c0_51, %c0_52], %120 {strides = array<i32>} : memref<1x16x128xf32, #tpu.memory_space<vmem>>, vector<1x16x128xf32>,
    return
  }
  func.func @transform_0(%arg0: i32) -> i32 {
    %c0_i32 = arith.constant 0 : i32
    %c0_i32_0 = arith.constant 0 : i32
    return %c0_i32 : i32
  }
  func.func @transform_1(%arg0: i32) -> (i32, i32, i32) {
    %c0_i32 = arith.constant 0 : i32
    %c0_i32_0 = arith.constant 0 : i32
    %c0_i32_1 = arith.constant 0 : i32
    return %arg0, %c0_i32, %c0_i32_0 : i32, i32, i32
  }
  func.func @transform_2(%arg0: i32) -> (i32, i32, i32) {
    %c0_i32 = arith.constant 0 : i32
    %c0_i32_0 = arith.constant 0 : i32
    %c0_i32_1 = arith.constant 0 : i32
    return %arg0, %c0_i32, %c0_i32_0 : i32, i32, i32
  }
  func.func @transform_3(%arg0: i32) -> (i32, i32) {
    %c0_i32 = arith.constant 0 : i32
    %c0_i32_0 = arith.constant 0 : i32
    %c0_i32_1 = arith.constant 0 : i32
    return %c0_i32, %c0_i32_0 : i32, i32
  }
  func.func @transform_4(%arg0: i32) -> (i32, i32) {
    %c0_i32 = arith.constant 0 : i32
    %c0_i32_0 = arith.constant 0 : i32
    %c0_i32_1 = arith.constant 0 : i32
    return %c0_i32, %c0_i32_0 : i32, i32
  }
  func.func @transform_5(%arg0: i32) -> (i32, i32) {
    %c0_i32 = arith.constant 0 : i32
    %c0_i32_0 = arith.constant 0 : i32
    %c0_i32_1 = arith.constant 0 : i32
    return %c0_i32, %c0_i32_0 : i32, i32
  }
  func.func @transform_6(%arg0: i32) -> (i32, i32) {
    %c0_i32 = arith.constant 0 : i32
    %c0_i32_0 = arith.constant 0 : i32
    %c0_i32_1 = arith.constant 0 : i32
    return %c0_i32, %c0_i32_0 : i32, i32
  }
  func.func @transform_7(%arg0: i32) -> (i32, i32) {
    %c0_i32 = arith.constant 0 : i32
    %c0_i32_0 = arith.constant 0 : i32
    %c0_i32_1 = arith.constant 0 : i32
    return %c0_i32, %c0_i32_0 : i32, i32
  }
  func.func @transform_8(%arg0: i32) -> (i32, i32) {
    %c0_i32 = arith.constant 0 : i32
    %c0_i32_0 = arith.constant 0 : i32
    %c0_i32_1 = arith.constant 0 : i32
    return %c0_i32, %c0_i32_0 : i32, i32
  }
  func.func @transform_9(%arg0: i32) -> (i32, i32) {
    %c0_i32 = arith.constant 0 : i32
    %c0_i32_0 = arith.constant 0 : i32
    %c0_i32_1 = arith.constant 0 : i32
    return %c0_i32, %c0_i32_0 : i32, i32
  }
  func.func @transform_10(%arg0: i32) -> (i32, i32) {
    %c0_i32 = arith.constant 0 : i32
    %c0_i32_0 = arith.constant 0 : i32
    %c0_i32_1 = arith.constant 0 : i32
    return %c0_i32, %c0_i32_0 : i32, i32
  }
  func.func @transform_11(%arg0: i32) -> (i32, i32) {
    %c0_i32 = arith.constant 0 : i32
    %c0_i32_0 = arith.constant 0 : i32
    %c0_i32_1 = arith.constant 0 : i32
    return %c0_i32, %c0_i32_0 : i32, i32
  }
  func.func @transform_12(%arg0: i32) -> (i32, i32, i32) {
    %c0_i32 = arith.constant 0 : i32
    %c0_i32_0 = arith.constant 0 : i32
    %c0_i32_1 = arith.constant 0 : i32
    return %arg0, %c0_i32, %c0_i32_0 : i32, i32, i32
  }
}

module attributes {stable_mosaic.version = 11 : i64} {
  func.func @_first_tcn_kernel(%arg0: i32, %arg1: memref<2xf32, #tpu.memory_space<smem>>, %arg2: memref<1x16x128xf32, #tpu.memory_space<vmem>>, %arg3: memref<1x1x128xf32, #tpu.memory_space<vmem>>, %arg4: memref<128x128xf32, #tpu.memory_space<vmem>>, %arg5: memref<1x128xf32, #tpu.memory_space<vmem>>, %arg6: memref<1x128xf32, #tpu.memory_space<vmem>>, %arg7: memref<3x128xf32, #tpu.memory_space<vmem>>, %arg8: memref<1x128xf32, #tpu.memory_space<vmem>>, %arg9: memref<128x1xf32, #tpu.memory_space<vmem>>, %arg10: memref<128x1xf32, #tpu.memory_space<vmem>>, %arg11: memref<128x128xf32, #tpu.memory_space<vmem>>, %arg12: memref<1x128xf32, #tpu.memory_space<vmem>>, %arg13: memref<1x16x128xf32, #tpu.memory_space<vmem>>, %arg14: memref<16x128xf32, #tpu.memory_space<vmem>>) attributes {dimension_semantics = [#tpu.dimension_semantics<parallel>], iteration_bounds = array<i64: 2>, scalar_prefetch = 0 : i64, scratch_operands = 1 : i64, tpu.core_type = #tpu.core_type<tc>, window_params = [{transform_indices = @transform_0, window_bounds = array<i64: 2>}, {transform_indices = @transform_1, window_bounds = array<i64: 1, 16, 128>}, {transform_indices = @transform_2, window_bounds = array<i64: 1, 1, 128>}, {pipeline_mode = #tpu.pipeline_mode<synchronous>, transform_indices = @transform_3, window_bounds = array<i64: 128, 128>}, {pipeline_mode = #tpu.pipeline_mode<synchronous>, transform_indices = @transform_4, window_bounds = array<i64: 1, 128>}, {pipeline_mode = #tpu.pipeline_mode<synchronous>, transform_indices = @transform_5, window_bounds = array<i64: 1, 128>}, {pipeline_mode = #tpu.pipeline_mode<synchronous>, transform_indices = @transform_6, window_bounds = array<i64: 3, 128>}, {pipeline_mode = #tpu.pipeline_mode<synchronous>, transform_indices = @transform_7, window_bounds = array<i64: 1, 128>}, {pipeline_mode = #tpu.pipeline_mode<synchronous>, transform_indices = @transform_8, window_bounds = array<i64: 128, 1>}, {pipeline_mode = #tpu.pipeline_mode<synchronous>, transform_indices = @transform_9, window_bounds = array<i64: 128, 1>}, {pipeline_mode = #tpu.pipeline_mode<synchronous>, transform_indices = @transform_10, window_bounds = array<i64: 128, 128>}, {pipeline_mode = #tpu.pipeline_mode<synchronous>, transform_indices = @transform_11, window_bounds = array<i64: 1, 128>}, {transform_indices = @transform_12, window_bounds = array<i64: 1, 16, 128>}]} {
    %c0 = arith.constant 0 : index
    %c0_0 = arith.constant 0 : index
    %c0_1 = arith.constant 0 : index
    %0 = vector.load %arg2[%c0, %c0_0, %c0_1] : memref<1x16x128xf32, #tpu.memory_space<vmem>>, vector<1x16x128xf32>
    %1 = vector.shape_cast %0 : vector<1x16x128xf32> to vector<16x128xf32>
    %c0_2 = arith.constant 0 : index
    %2 = memref.load %arg1[%c0_2] : memref<2xf32, #tpu.memory_space<smem>>
    %c1 = arith.constant 1 : index
    %3 = memref.load %arg1[%c1] : memref<2xf32, #tpu.memory_space<smem>>
    %c0_3 = arith.constant 0 : index
    %c0_4 = arith.constant 0 : index
    %4 = vector.load %arg4[%c0_3, %c0_4] : memref<128x128xf32, #tpu.memory_space<vmem>>, vector<128x128xf32>
    %cst = arith.constant dense<0.000000e+00> : vector<16x128xf32>
    %5 = tpu.matmul %1, %4, %cst {dimension_numbers = #tpu.dot_dimension_numbers<[1], [0], [0], [1], [0, 0, 1, 1], [], []>} : vector<16x128xf32>, vector<128x128xf32>, vector<16x128xf32> -> vector<16x128xf32>
    %c0_5 = arith.constant 0 : index
    %c0_6 = arith.constant 0 : index
    %c0_7 = arith.constant 0 : index
    %6 = vector.load %arg3[%c0_5, %c0_6, %c0_7] : memref<1x1x128xf32, #tpu.memory_space<vmem>>, vector<1x1x128xf32>
    %7 = vector.shape_cast %6 : vector<1x1x128xf32> to vector<1x128xf32>
    %8 = vector.broadcast %7 : vector<1x128xf32> to vector<16x128xf32>
    %9 = arith.addf %5, %8 : vector<16x128xf32>
    %cst_8 = arith.constant 0.000000e+00 : f32
    %10 = vector.broadcast %cst_8 : f32 to vector<16x128xf32>
    %11 = arith.cmpf ogt, %9, %10 : vector<16x128xf32>
    %12 = vector.broadcast %2 : f32 to vector<16x128xf32>
    %13 = arith.mulf %12, %9 : vector<16x128xf32>
    %14 = arith.select %11, %9, %13 : vector<16x128xi1>, vector<16x128xf32>
    %15 = vector.shape_cast %14 : vector<16x128xf32> to vector<1x16x128xf32>
    %cst_9 = arith.constant dense<0.000000e+00> : vector<1xf32>
    %16 = vector.multi_reduction <add>, %15, %cst_9 [1, 2] : vector<1x16x128xf32> to vector<1xf32>
    %17 = vector.shape_cast %16 : vector<1xf32> to vector<1x1x1xf32>
    %18 = vector.extract %17[0, 0, 0] : f32 from vector<1x1x1xf32>
    %cst_10 = arith.constant 0.001953125 : f32
    %19 = arith.mulf %18, %cst_10 : f32
    %20 = arith.mulf %14, %14 : vector<16x128xf32>
    %21 = vector.shape_cast %20 : vector<16x128xf32> to vector<1x16x128xf32>
    %cst_11 = arith.constant dense<0.000000e+00> : vector<1xf32>
    %22 = vector.multi_reduction <add>, %21, %cst_11 [1, 2] : vector<1x16x128xf32> to vector<1xf32>
    %23 = vector.shape_cast %22 : vector<1xf32> to vector<1x1x1xf32>
    %24 = vector.extract %23[0, 0, 0] : f32 from vector<1x1x1xf32>
    %cst_12 = arith.constant 0.001953125 : f32
    %25 = arith.mulf %24, %cst_12 : f32
    %26 = arith.mulf %19, %19 : f32
    %27 = arith.subf %25, %26 : f32
    %c0_13 = arith.constant 0 : index
    %c0_14 = arith.constant 0 : index
    %28 = vector.load %arg5[%c0_13, %c0_14] : memref<1x128xf32, #tpu.memory_space<vmem>>, vector<1x128xf32>
    %cst_15 = arith.constant 9.99999997E-7 : f32
    %29 = arith.addf %27, %cst_15 : f32
    %30 = math.rsqrt %29 : f32
    %31 = vector.broadcast %30 : f32 to vector<1x128xf32>
    %32 = arith.mulf %28, %31 : vector<1x128xf32>
    %c0_16 = arith.constant 0 : index
    %c0_17 = arith.constant 0 : index
    %33 = vector.load %arg6[%c0_16, %c0_17] : memref<1x128xf32, #tpu.memory_space<vmem>>, vector<1x128xf32>
    %34 = vector.broadcast %19 : f32 to vector<1x128xf32>
    %35 = arith.mulf %34, %32 : vector<1x128xf32>
    %36 = arith.subf %33, %35 : vector<1x128xf32>
    %c0_18 = arith.constant 0 : index
    %c0_19 = arith.constant 0 : index
    %37 = vector.load %arg7[%c0_18, %c0_19] : memref<3x128xf32, #tpu.memory_space<vmem>>, vector<3x128xf32>
    %38 = vector.broadcast %32 : vector<1x128xf32> to vector<3x128xf32>
    %39 = arith.mulf %37, %38 : vector<3x128xf32>
    %c0_20 = arith.constant 0 : index
    %c0_21 = arith.constant 0 : index
    %40 = vector.load %arg8[%c0_20, %c0_21] : memref<1x128xf32, #tpu.memory_space<vmem>>, vector<1x128xf32>
    %cst_22 = arith.constant dense<0.000000e+00> : vector<128xf32>
    %41 = vector.multi_reduction <add>, %37, %cst_22 [0] : vector<3x128xf32> to vector<128xf32>
    %42 = vector.shape_cast %41 : vector<128xf32> to vector<1x128xf32>
    %43 = arith.mulf %36, %42 : vector<1x128xf32>
    %44 = arith.addf %40, %43 : vector<1x128xf32>
    %45 = vector.extract_strided_slice %39 {offsets = [1, 0], sizes = [1, 128], strides = [1, 1]} : vector<3x128xf32> to vector<1x128xf32>
    %46 = vector.broadcast %45 : vector<1x128xf32> to vector<16x128xf32>
    %47 = arith.mulf %46, %14 : vector<16x128xf32>
    %48 = vector.extract_strided_slice %39 {offsets = [0, 0], sizes = [1, 128], strides = [1, 1]} : vector<3x128xf32> to vector<1x128xf32>
    %c1_i32 = arith.constant 1 : i32
    %49 = tpu.dynamic_rotate %14 by %c1_i32 dim 0 : vector<16x128xf32>, i32 -> vector<16x128xf32>
    %50 = vector.broadcast %48 : vector<1x128xf32> to vector<16x128xf32>
    %51 = arith.mulf %50, %49 : vector<16x128xf32>
    %52 = arith.addf %47, %51 : vector<16x128xf32>
    %53 = vector.extract_strided_slice %39 {offsets = [2, 0], sizes = [1, 128], strides = [1, 1]} : vector<3x128xf32> to vector<1x128xf32>
    %c15_i32 = arith.constant 15 : i32
    %54 = tpu.dynamic_rotate %14 by %c15_i32 dim 0 : vector<16x128xf32>, i32 -> vector<16x128xf32>
    %55 = vector.broadcast %53 : vector<1x128xf32> to vector<16x128xf32>
    %56 = arith.mulf %55, %54 : vector<16x128xf32>
    %57 = arith.addf %52, %56 : vector<16x128xf32>
    %58 = vector.broadcast %44 : vector<1x128xf32> to vector<16x128xf32>
    %59 = arith.addf %57, %58 : vector<16x128xf32>
    %c0_23 = arith.constant 0 : index
    %c0_24 = arith.constant 0 : index
    %60 = vector.load %arg14[%c0_23, %c0_24] : memref<16x128xf32, #tpu.memory_space<vmem>>, vector<16x128xf32>
    tpu.vector_store %arg14[%c0_23, %c0_24], %59 {strides = array<i32>} : memref<16x128xf32, #tpu.memory_space<vmem>>, vector<16x128xf32>,
    %61 = vector.extract_strided_slice %37 {offsets = [0, 0], sizes = [1, 128], strides = [1, 1]} : vector<3x128xf32> to vector<1x128xf32>
    %62 = vector.extract_strided_slice %14 {offsets = [15, 0], sizes = [1, 128], strides = [1, 1]} : vector<16x128xf32> to vector<1x128xf32>
    %63 = arith.mulf %32, %62 : vector<1x128xf32>
    %64 = arith.addf %63, %36 : vector<1x128xf32>
    %65 = arith.mulf %61, %64 : vector<1x128xf32>
    %c0_25 = arith.constant 0 : index
    %c0_26 = arith.constant 0 : index
    %66 = vector.load %arg14[%c0_25, %c0_26] : memref<16x128xf32, #tpu.memory_space<vmem>>, vector<1x128xf32>
    %67 = arith.subf %66, %65 : vector<1x128xf32>
    %c0_27 = arith.constant 0 : index
    %c0_28 = arith.constant 0 : index
    %68 = vector.load %arg14[%c0_27, %c0_28] : memref<16x128xf32, #tpu.memory_space<vmem>>, vector<1x128xf32>
    tpu.vector_store %arg14[%c0_27, %c0_28], %67 {strides = array<i32>} : memref<16x128xf32, #tpu.memory_space<vmem>>, vector<1x128xf32>,
    %69 = vector.extract_strided_slice %37 {offsets = [2, 0], sizes = [1, 128], strides = [1, 1]} : vector<3x128xf32> to vector<1x128xf32>
    %70 = vector.extract_strided_slice %14 {offsets = [0, 0], sizes = [1, 128], strides = [1, 1]} : vector<16x128xf32> to vector<1x128xf32>
    %71 = arith.mulf %32, %70 : vector<1x128xf32>
    %72 = arith.addf %71, %36 : vector<1x128xf32>
    %73 = arith.mulf %69, %72 : vector<1x128xf32>
    %c15 = arith.constant 15 : index
    %c0_29 = arith.constant 0 : index
    %74 = vector.load %arg14[%c15, %c0_29] : memref<16x128xf32, #tpu.memory_space<vmem>>, vector<1x128xf32>
    %75 = arith.subf %74, %73 : vector<1x128xf32>
    %c15_30 = arith.constant 15 : index
    %c0_31 = arith.constant 0 : index
    %76 = vector.load %arg14[%c15_30, %c0_31] : memref<16x128xf32, #tpu.memory_space<vmem>>, vector<1x128xf32>
    tpu.vector_store %arg14[%c15_30, %c0_31], %75 {strides = array<i32>} : memref<16x128xf32, #tpu.memory_space<vmem>>, vector<1x128xf32>,
    %c0_32 = arith.constant 0 : index
    %c0_33 = arith.constant 0 : index
    %77 = vector.load %arg14[%c0_32, %c0_33] : memref<16x128xf32, #tpu.memory_space<vmem>>, vector<16x128xf32>
    %cst_34 = arith.constant 0.000000e+00 : f32
    %78 = vector.broadcast %cst_34 : f32 to vector<16x128xf32>
    %79 = arith.cmpf ogt, %77, %78 : vector<16x128xf32>
    %80 = vector.broadcast %3 : f32 to vector<16x128xf32>
    %81 = arith.mulf %80, %77 : vector<16x128xf32>
    %82 = arith.select %79, %77, %81 : vector<16x128xi1>, vector<16x128xf32>
    %83 = vector.shape_cast %82 : vector<16x128xf32> to vector<1x16x128xf32>
    %cst_35 = arith.constant dense<0.000000e+00> : vector<1xf32>
    %84 = vector.multi_reduction <add>, %83, %cst_35 [1, 2] : vector<1x16x128xf32> to vector<1xf32>
    %85 = vector.shape_cast %84 : vector<1xf32> to vector<1x1x1xf32>
    %86 = vector.extract %85[0, 0, 0] : f32 from vector<1x1x1xf32>
    %cst_36 = arith.constant 0.001953125 : f32
    %87 = arith.mulf %86, %cst_36 : f32
    %88 = arith.mulf %82, %82 : vector<16x128xf32>
    %89 = vector.shape_cast %88 : vector<16x128xf32> to vector<1x16x128xf32>
    %cst_37 = arith.constant dense<0.000000e+00> : vector<1xf32>
    %90 = vector.multi_reduction <add>, %89, %cst_37 [1, 2] : vector<1x16x128xf32> to vector<1xf32>
    %91 = vector.shape_cast %90 : vector<1xf32> to vector<1x1x1xf32>
    %92 = vector.extract %91[0, 0, 0] : f32 from vector<1x1x1xf32>
    %cst_38 = arith.constant 0.001953125 : f32
    %93 = arith.mulf %92, %cst_38 : f32
    %94 = arith.mulf %87, %87 : f32
    %95 = arith.subf %93, %94 : f32
    %c0_39 = arith.constant 0 : index
    %c0_40 = arith.constant 0 : index
    %96 = vector.load %arg9[%c0_39, %c0_40] : memref<128x1xf32, #tpu.memory_space<vmem>>, vector<128x1xf32>
    %cst_41 = arith.constant 9.99999997E-7 : f32
    %97 = arith.addf %95, %cst_41 : f32
    %98 = math.rsqrt %97 : f32
    %99 = vector.broadcast %98 : f32 to vector<128x1xf32>
    %100 = arith.mulf %96, %99 : vector<128x1xf32>
    %c0_42 = arith.constant 0 : index
    %c0_43 = arith.constant 0 : index
    %101 = vector.load %arg10[%c0_42, %c0_43] : memref<128x1xf32, #tpu.memory_space<vmem>>, vector<128x1xf32>
    %102 = vector.broadcast %87 : f32 to vector<128x1xf32>
    %103 = arith.mulf %102, %100 : vector<128x1xf32>
    %104 = arith.subf %101, %103 : vector<128x1xf32>
    %c0_44 = arith.constant 0 : index
    %c0_45 = arith.constant 0 : index
    %105 = vector.load %arg11[%c0_44, %c0_45] : memref<128x128xf32, #tpu.memory_space<vmem>>, vector<128x128xf32>
    %106 = vector.broadcast %100 : vector<128x1xf32> to vector<128x128xf32>
    %107 = arith.mulf %105, %106 : vector<128x128xf32>
    %c0_46 = arith.constant 0 : index
    %c0_47 = arith.constant 0 : index
    %108 = vector.load %arg12[%c0_46, %c0_47] : memref<1x128xf32, #tpu.memory_space<vmem>>, vector<1x128xf32>
    %109 = vector.broadcast %104 : vector<128x1xf32> to vector<128x128xf32>
    %110 = arith.mulf %105, %109 : vector<128x128xf32>
    %cst_48 = arith.constant dense<0.000000e+00> : vector<128xf32>
    %111 = vector.multi_reduction <add>, %110, %cst_48 [0] : vector<128x128xf32> to vector<128xf32>
    %112 = vector.shape_cast %111 : vector<128xf32> to vector<1x128xf32>
    %113 = arith.addf %108, %112 : vector<1x128xf32>
    %cst_49 = arith.constant dense<0.000000e+00> : vector<16x128xf32>
    %114 = tpu.matmul %82, %107, %cst_49 {dimension_numbers = #tpu.dot_dimension_numbers<[1], [0], [0], [1], [0, 0, 1, 1], [], []>} : vector<16x128xf32>, vector<128x128xf32>, vector<16x128xf32> -> vector<16x128xf32>
    %115 = vector.broadcast %113 : vector<1x128xf32> to vector<16x128xf32>
    %116 = arith.addf %114, %115 : vector<16x128xf32>
    %117 = arith.addf %116, %1 : vector<16x128xf32>
    %c0_50 = arith.constant 0 : index
    %c0_51 = arith.constant 0 : index
    %c0_52 = arith.constant 0 : index
    %118 = vector.load %arg13[%c0_50, %c0_51, %c0_52] : memref<1x16x128xf32, #tpu.memory_space<vmem>>, vector<1x16x128xf32>
    %119 = vector.shape_cast %118 : vector<1x16x128xf32> to vector<16x128xf32>
    %120 = vector.shape_cast %117 : vector<16x128xf32> to vector<1x16x128xf32>
    tpu.vector_store %arg13[%c0_50, %c0_51, %c0_52], %120 {strides = array<i32>} : memref<1x16x128xf32, #tpu.memory_space<vmem>>, vector<1x16x128xf32>,
    return
  }
  func.func @transform_0(%arg0: i32) -> i32 {
    %c0_i32 = arith.constant 0 : i32
    %c0_i32_0 = arith.constant 0 : i32
    return %c0_i32 : i32
  }
  func.func @transform_1(%arg0: i32) -> (i32, i32, i32) {
    %c0_i32 = arith.constant 0 : i32
    %c0_i32_0 = arith.constant 0 : i32
    %c0_i32_1 = arith.constant 0 : i32
    return %arg0, %c0_i32, %c0_i32_0 : i32, i32, i32
  }
  func.func @transform_2(%arg0: i32) -> (i32, i32, i32) {
    %c0_i32 = arith.constant 0 : i32
    %c0_i32_0 = arith.constant 0 : i32
    %c0_i32_1 = arith.constant 0 : i32
    return %arg0, %c0_i32, %c0_i32_0 : i32, i32, i32
  }
  func.func @transform_3(%arg0: i32) -> (i32, i32) {
    %c0_i32 = arith.constant 0 : i32
    %c0_i32_0 = arith.constant 0 : i32
    %c0_i32_1 = arith.constant 0 : i32
    return %c0_i32, %c0_i32_0 : i32, i32
  }
  func.func @transform_4(%arg0: i32) -> (i32, i32) {
    %c0_i32 = arith.constant 0 : i32
    %c0_i32_0 = arith.constant 0 : i32
    %c0_i32_1 = arith.constant 0 : i32
    return %c0_i32, %c0_i32_0 : i32, i32
  }
  func.func @transform_5(%arg0: i32) -> (i32, i32) {
    %c0_i32 = arith.constant 0 : i32
    %c0_i32_0 = arith.constant 0 : i32
    %c0_i32_1 = arith.constant 0 : i32
    return %c0_i32, %c0_i32_0 : i32, i32
  }
  func.func @transform_6(%arg0: i32) -> (i32, i32) {
    %c0_i32 = arith.constant 0 : i32
    %c0_i32_0 = arith.constant 0 : i32
    %c0_i32_1 = arith.constant 0 : i32
    return %c0_i32, %c0_i32_0 : i32, i32
  }
  func.func @transform_7(%arg0: i32) -> (i32, i32) {
    %c0_i32 = arith.constant 0 : i32
    %c0_i32_0 = arith.constant 0 : i32
    %c0_i32_1 = arith.constant 0 : i32
    return %c0_i32, %c0_i32_0 : i32, i32
  }
  func.func @transform_8(%arg0: i32) -> (i32, i32) {
    %c0_i32 = arith.constant 0 : i32
    %c0_i32_0 = arith.constant 0 : i32
    %c0_i32_1 = arith.constant 0 : i32
    return %c0_i32, %c0_i32_0 : i32, i32
  }
  func.func @transform_9(%arg0: i32) -> (i32, i32) {
    %c0_i32 = arith.constant 0 : i32
    %c0_i32_0 = arith.constant 0 : i32
    %c0_i32_1 = arith.constant 0 : i32
    return %c0_i32, %c0_i32_0 : i32, i32
  }
  func.func @transform_10(%arg0: i32) -> (i32, i32) {
    %c0_i32 = arith.constant 0 : i32
    %c0_i32_0 = arith.constant 0 : i32
    %c0_i32_1 = arith.constant 0 : i32
    return %c0_i32, %c0_i32_0 : i32, i32
  }
  func.func @transform_11(%arg0: i32) -> (i32, i32) {
    %c0_i32 = arith.constant 0 : i32
    %c0_i32_0 = arith.constant 0 : i32
    %c0_i32_1 = arith.constant 0 : i32
    return %c0_i32, %c0_i32_0 : i32, i32
  }
  func.func @transform_12(%arg0: i32) -> (i32, i32, i32) {
    %c0_i32 = arith.constant 0 : i32
    %c0_i32_0 = arith.constant 0 : i32
    %c0_i32_1 = arith.constant 0 : i32
    return %arg0, %c0_i32, %c0_i32_0 : i32, i32, i32
  }
}

</mosaic_0001>

<bundles_post_ra>
// kernel: tpu_custom_call.1
= control target key start
LH: loop header
LB: loop body
LE: loop exit
PB: predicated region body
PF: predicated region fallthrough
CT: control target
= control target key end

     0   :  { %s2260_s0 = inlined_call_operand.hbm [shape: f32[2], index: 0, kind: input, shape index: {}]   ;;  %s2261_s1 = inlined_call_operand.hbm [shape: f32[2,16,128], index: 1, kind: input, shape index: {}]   ;;  %s2262_s2 = inlined_call_operand.vmem [shape: f32[2,1,128], index: 2, kind: input, shape index: {}]   ;;  %s2263_s3 = inlined_call_operand.vmem [shape: f32[128,128], index: 3, kind: input, shape index: {}]   ;;  %s2264_s4 = inlined_call_operand.vmem [shape: f32[1,128], index: 4, kind: input, shape index: {}]   ;;  %s2265_s5 = inlined_call_operand.vmem [shape: f32[1,128], index: 5, kind: input, shape index: {}]   ;;  %s2266_s6 = inlined_call_operand.vmem [shape: f32[3,128], index: 6, kind: input, shape index: {}]   ;;  %s2267_s7 = inlined_call_operand.vmem [shape: f32[1,128], index: 7, kind: input, shape index: {}]   ;;  %s2268_s8 = inlined_call_operand.vmem [shape: f32[128,1], index: 8, kind: input, shape index: {}]   ;;  %s2269_s9 = inlined_call_operand.vmem [shape: f32[128,1], index: 9, kind: input, shape index: {}]   ;;  %s2270_s10 = inlined_call_operand.vmem [shape: f32[128,128], index: 10, kind: input, shape index: {}]   ;;  %s2271_s11 = inlined_call_operand.vmem [shape: f32[1,128], index: 11, kind: input, shape index: {}]   ;;  %s2272_s12 = inlined_call_operand.hbm [shape: f32[2,16,128], index: 12, kind: output, shape index: {}]  }
   0x1   :  { %2283 = sst [smem:[#allocation18_spill]] %s2272_s12 }
   0x2   :  { %17 = vsyncpa [#allocation6], 0 }
   0x3   :  { %18 = vsyncpa [#allocation4], 0 }
   0x4   :  { %20 = vsyncpa [#allocation4 + $0x1], 0 }
   0x5   :  { %21 = vsyncpa [#allocation5], 0 }
   0x6   :  { %23 = vsyncpa [#allocation5 + $0x1], 0  ;;  %s1712_s21 = smov 0   ;;  %s1714_s22 = smov 0  }
   0x7   :  { %s1716_s23 = smov 0   ;;  %s1718_s24 = smov 0  }
   0x8 LB: > { %2284 = sst [smem:[#allocation12_spill]] %s1624_s21  ;;  %s1733_s25 = sadd.s32 4294967295, %s1636_s24   ;;  %s1636_s24 = sphi %s1718_s24, %s2307_s24   ;;  %s1632_s23 = sphi %s1716_s23, %s2309_s23   ;;  %s1628_s22 = sphi %s1714_s22, %s2311_s22   ;;  %s1624_s21 = sphi %s1712_s21, %s2310_s21  }
   0x9   : > { %2285 = sst [smem:[#allocation13_spill]] %s1632_s23  ;;  %s1252_s26 = sadd.s32 4294967294, %s1636_s24  }
   0xa   : > { %2286 = sst [smem:[#allocation14_spill]] %s1636_s24  ;;  %s1737_s27 = sadd.s32 1, %s1636_s24  }
   0xb   : > { %2287 = sst [smem:[#allocation15_spill]] %s1737_s27  ;;  %s57_s28 = sadd.s32 1, %s1632_s23 }
   0xc   : > { %s54_s29 = ssub.s32 %s1636_s24, %s1737_s27  ;;  %p64_p0 = scmp.ne.s32.totalorder %s1632_s23, %s1628_s22 }
   0xd   : > { %p55_p1 = scmp.eq.s32.totalorder %s54_s29, 0  ;;  %p65_p2 = scmp.eq.s32.totalorder %s1636_s24, 0 }
   0xe   : > { %p70_p3 = scmp.ne.s32.totalorder %s1628_s22, %s1624_s21  ;;  %p2273_p4 = scmp.eq.s32.totalorder %s1733_s25, 0 }
   0xf   : > { %s1749_s30 = scalar_select %p55_p1, %s1632_s23, %s57_s28  }
  0x10   : > { %p1751_p5 = por %p65_p2, %p64_p0  ;;  %p1757_p6 = por %p2273_p4, %p70_p3 }
  0x11   : > { %2288 = sst [smem:[#allocation16_spill]] %s1749_s30  ;;  %p309_p7 = scmp.eq.s32.totalorder %s1733_s25, 1 }
  0x12   : > { %s2290_s14 = scalar_select %p1757_p6, 1, 0 }
  0x13   : > { %p315_p8 = scmp.eq.s32.totalorder %s1252_s26, 1  ;;  %p1253_p9 = scmp.ge.s32.totalorder %s1636_s24, 1 }
  0x14   : > { %p322_p10 = scmp.lt.s32.totalorder %s1636_s24, 3  ;;  %p1764_p11 = por %p309_p7, %p64_p0 }
  0x15   : > { %p1768_p12 = por %p315_p8, %p70_p3  ;;  %p1475_p4 = scmp.lt.s32.totalorder %s1636_s24, 2 }
  0x16   : > { %s2291_s15 = scalar_select %p1764_p11, 1, 0 }
  0x17   : > { %s2292_s16 = scalar_select %p1768_p12, 1, 0 }
  0x18   : > { %p1772_p13 = pnand %p1253_p9, %p322_p10  ;;  %s371_s18 = sand.u32 1, %s1632_s23  }
  0x19   : > { %2293 = sst [smem:[#allocation17_spill]] %s2292_s16  ;;  %s1270_s19 = sshll.u32 %s1636_s24, 8 }
  0x1a   : > { %p1462_p2 = pneg %p1772_p13  ;;  %p2295_p6 = scmp.eq.s32.totalorder %s1733_s25, 0 }
  0x1b   : > { %p1786_p7 = pnand %p1475_p4, %p1751_p5  ;;  %s1256_s26 = sshll.u32 %s371_s18, 4 }
  0x1c   : > { %p1463_p0 = pnand %p1462_p2, %p2295_p6  ;;  %s1523_s30 = scalar_lea.hbm %s2260_s0, 16 }
  0x1d   : > { %p1524_p3 = scmp.ne.s32.totalorder %s2260_s0, %s1523_s30  ;;  %p1530_p6 = scmp.lt.u32.totalorder %s1523_s30, %s2260_s0 }
  0x1e   : > { %p1525_p8 = pneg %p1463_p0 }
  0x20   : > { %p1526_p9 = pnand %p1525_p8, %p1524_p3 }
  0x22   : > { %p1527_p10 = pneg %p1526_p9 }
  0x24   : > { %p1532_p4 = pnand %p1530_p6, %p1527_p10 }
  0x26   : > { %1535 = shalt.err (!%p1532_p4)
}
  0x27   : > { %s1638_s13 = smov [#allocation3]   ;;  %s1805_s27 = scalar_lea.hbm %s2261_s1, %s1270_s19 }
  0x28   : > { %1465 = dma.hbm_to_smem (!%p1463_p0), %s2260_s0, 16, %s1638_s13, [#allocation6]  }
  0x29   : > { %s375_s23 = scalar_lea.vmem [#allocation7], %s1256_s26  ;;  %s1809_s30 = scalar_lea.sflag [#allocation4], %s371_s18 }
  0x2a   : > { %s382_s24 = sshll.u32 %s375_s23, 4  ;;  %s1536_s16 = scalar_lea.hbm %s1805_s27, 256  ;;  %s1807_s24 = int_to_ptr.vmem [resolvable:$true] %s382_s24 }
  0x2b   : > { %p1537_p5 = scmp.ne.s32.totalorder %s1805_s27, %s1536_s16  ;;  %p1538_p2 = pneg %p1786_p7 }
  0x2c   : > { %s1541_s19 = scalar_lea.hbm %s2261_s1, 512  ;;  %p1542_p8 = scmp.lt.u32.totalorder %s1805_s27, %s2261_s1 }
  0x2d   : > { %p1539_p0 = pnand %p1538_p2, %p1537_p5  ;;  %p1543_p9 = scmp.lt.u32.totalorder %s1541_s19, %s1536_s16 }
  0x2e   : > { %p1545_p6 = scmp.lt.u32.totalorder %s1536_s16, %s1805_s27 }
  0x2f   : > { %p1540_p3 = pneg %p1539_p0  ;;  %p1544_p10 = por %p1543_p9, %p1542_p8 }
  0x31   : > { %p1546_p4 = por %p1545_p6, %p1544_p10 }
  0x33   : > { %p1547_p1 = pnand %p1546_p4, %p1540_p3 }
  0x35   : > { %1550 = shalt.err (!%p1547_p1)
}
  0x36   : > { %s1551_s18 = scalar_lea.vmem %s1807_s24, 256  ;;  %s1639_s26 = smov [#allocation7]  }
  0x37   : > { %p1552_p5 = scmp.ne.s32.totalorder %s1807_s24, %s1551_s18  ;;  %s1556_s29 = sshll.u32 %s1639_s26, 4  ;;  %s1557_s29 = int_to_ptr.vmem [resolvable:$false] %s1556_s29 }
  0x38   : > { %s1558_s23 = scalar_lea.vmem %s1557_s29, 512  ;;  %p1559_p11 = scmp.lt.s32.totalorder %s1807_s24, %s1557_s29 }
  0x39   : > { %p1554_p0 = pnand %p1552_p5, %p1538_p2  ;;  %p1560_p8 = scmp.lt.s32.totalorder %s1558_s23, %s1551_s18 }
  0x3b   : > { %p1555_p12 = pneg %p1554_p0  ;;  %p1561_p9 = por %p1560_p8, %p1559_p11 }
  0x3d   : > { %p1562_p10 = pnand %p1561_p9, %p1555_p12 }
  0x3f   : > { %1565 = shalt.err (!%p1562_p10)
}
  0x40   : > { %s1640_s16 = smov 128   ;;  %s1641_s12 = smov 8  }
  0x41   : > { %1469 = dma.hbm_to_vmem [thread:$0]  (!%p1786_p7), %s1805_s27, 256, %s1807_s24, %s1809_s30, %s1640_s16, %s1640_s16, %s1641_s12  }
  0x42   : > { %400 = sbr.rel (%p1772_p13) target bundleno = 1339 (0x53b), region = 68  ;;  %p2297_p1 = scmp.eq.s32.totalorder (!%p1772_p13), %s1733_s25, 0 }
  0x49   : > { %1611 = dma.done.wait (%p2297_p1), [#allocation6], 16   ;;  %p2298_p2 = pmov %p2297_p1 }
  0x4a   : > { %s1844_s21 = sand.u32 1, %s1628_s22   ;;  %p2299_p11 = scmp.ne.s32.totalorder %s2290_s14, 0 }
  0x4b   : > { %1613 = vsyncadd (%p2298_p2), [#allocation6], 4294967280  ;;  %s1261_s19 = sshll.u32 %s1844_s21, 4  ;;  %s407_s13 = scalar_lea.sflag [#allocation4], %s1844_s21 }
  0x4c   : > { %s1850_s20 = scalar_lea.vmem [#allocation7], %s1261_s19 }
  0x4d   : > { %1615 = dma.done.wait (%p2299_p11), %s407_s13, 256  }
  0x4e   : > { %1617 = vsyncadd (%p2299_p11), %s407_s13, 4294967040 }
  0x4f   : > { %415 = sfence }
  0x50   : > { %v462_v0 = vld [vmem:[%s2263_s3] sm:$0xff]  ;;  %v463_v1 = vld [vmem:[%s2263_s3 + $0x8] sm:$0xff]  ;;  %v464_v2 = vld [vmem:[%s2263_s3 + $0x10] sm:$0xff]  ;;  %p455_p12 = scmp.lt.s32.totalorder %s1733_s25, 1  ;;  %s460_s29 = sld [smem:[#allocation3]]  ;;  %vm613_vm2 = vcmask 1042432   ;;  %v606_v60 = vlaneseq }
  0x51   : > { %v1378_v3 = vpack.c.bf16 %v463_v1, %v462_v0  ;;  %v465_v4 = vld [vmem:[%s2263_s3 + $0x18] sm:$0xff]  ;;  %v466_v6 = vld [vmem:[%s2263_s3 + $0x20] sm:$0xff]  ;;  %v467_v7 = vld [vmem:[%s2263_s3 + $0x28] sm:$0xff]  ;;  %v1642_v62 = vmov 1966171168   ;;  %s454_s23 = scalar_lea.vmem [#allocation8], %s1261_s19 }
  0x52   : > { %v1382_v5 = vpack.c.bf16 %v465_v4, %v464_v2  ;;  %v1386_v8 = vpack.c.bf16 %v467_v7, %v466_v6  ;;  %v1875_v9 = vld [vmem:[%s1850_s20] sm:$0xff]  ;;  %v469_v11 = vld [vmem:[%s2263_s3 + $0x38] sm:$0xff]  ;;  %v471_v14 = vld [vmem:[%s2263_s3 + $0x48] sm:$0xff]  ;;  %s456_s26 = scalar_select %p455_p12, %s1733_s25, 1  ;;  %v670_v63 = vunpack.c.l.s4 %v1642_v62  ;;  %v607_v0 = vshrl.u32 %v606_v60, 7 }
  0x53   : > { %1379 = vmatprep.subr.bf16.mxu0 %v1378_v3  ;;  %v468_v10 = vld [vmem:[%s2263_s3 + $0x30] sm:$0xff]  ;;  %1340 = vmatprep.mubr.f32.mxu0 %v1875_v9  ;;  %v470_v13 = vld [vmem:[%s2263_s3 + $0x40] sm:$0xff]  ;;  %v473_v17 = vld [vmem:[%s2263_s3 + $0x58] sm:$0xff]  ;;  %p2301_p7 = scmp.ne.s32.totalorder %s2291_s15, 0 }
  0x54   : > { %1381 = vmatpush3.bf16.msra.mxu0 %v1378_v3  ;;  %v1390_v12 = vpack.c.bf16 %v469_v11, %v468_v10  ;;  %v1394_v15 = vpack.c.bf16 %v471_v14, %v470_v13  ;;  %v472_v16 = vld [vmem:[%s2263_s3 + $0x50] sm:$0xff]  ;;  %v474_v19 = vld [vmem:[%s2263_s3 + $0x60] sm:$0xff]  ;;  %v475_v20 = vld [vmem:[%s2263_s3 + $0x68] sm:$0xff]  ;;  %s457_s16 = scalar_lea.vmem %s2262_s2, %s456_s26  ;;  %v671_v2 = vunpack.c.0.s8 %v670_v63  ;;  %v1942_v7 = vsub.s32 0, %v607_v0 }
  0x55   : > { %1383 = vmatprep.subr.bf16.mxu0 %v1382_v5  ;;  %v1398_v18 = vpack.c.bf16 %v473_v17, %v472_v16  ;;  %v1402_v21 = vpack.c.bf16 %v475_v20, %v474_v19  ;;  %v476_v22 = vld [vmem:[%s2263_s3 + $0x70] sm:$0xff]  ;;  %v477_v23 = vld [vmem:[%s2263_s3 + $0x78] sm:$0xff]  ;;  %v1264_v26 = vld [vmem:[%s457_s16] ss:$0 sm:$0xff]  ;;  %v625_v17 = vsub.s32 1, %v607_v0  ;;  %vm633_vm3 = vcmp.lt.s32.totalorder %v607_v0, 1 }
  0x56   : > { %v1406_v24 = vpack.c.bf16 %v477_v23, %v476_v22  ;;  %v1909_v25 = vld [vmem:[%s1850_s20 + $0x8] sm:$0xff]  ;;  %v562_v28 = vstv %s460_s29  ;;  %v1934_v56 = vld [vmem:[%s2266_s6] sm:$0x7]  ;;  %v674_v6 = vsub.s32 %v671_v2, %v607_v0  ;;  %vm646_vm4 = vcmp.lt.s32.totalorder %v607_v0, 7  ;;  %s1158_s16 = sshll.u32 %s454_s23, 4  ;;  %s2209_s16 = int_to_ptr.vmem [resolvable:$true] %s1158_s16 }
  0x57   : > { %v614_v57 = vsel %vm613_vm2, %v1934_v56, 0.0  ;;  %v593_v4 = vld [vmem:[%s2264_s4] sm:$0x1] }
  0x58   : > { %1385 = vmatpush3.bf16.msra.mxu0 %v1382_v5  ;;  %v615_v58 = vrot.slane %v614_v57, 4 }
  0x59   : > { %1387 = vmatprep.subr.bf16.mxu0 %v1386_v8 }
  0x5a   : > { %v616_v59 = vadd.f32 %v615_v58, %v614_v57 }
  0x5c   : > { %1389 = vmatpush3.bf16.msra.mxu0 %v1386_v8  ;;  %v617_v61 = vrot.slane %v616_v59, 2 }
  0x5d   : > { %1391 = vmatprep.subr.bf16.mxu0 %v1390_v12 }
  0x5e   : > { %v618_v1 = vadd.f32 %v617_v61, %v616_v59 }
  0x60   : > { %1393 = vmatpush3.bf16.msra.mxu0 %v1390_v12  ;;  %v619_v5 = vrot.slane %v618_v1, 1  ;;  %v600_v12 = vld [vmem:[%s2265_s5] sm:$0x1] }
  0x61   : > { %1395 = vmatprep.subr.bf16.mxu0 %v1394_v15 }
  0x62   : > { %v620_v13 = vadd.f32 %v619_v5, %v618_v1 }
  0x64   : > { %1397 = vmatpush3.bf16.msra.mxu0 %v1394_v15 }
  0x65   : > { %1399 = vmatprep.subr.bf16.mxu0 %v1398_v18 }
  0x68   : > { %1401 = vmatpush3.bf16.msra.mxu0 %v1398_v18  ;;  %v651_v18 = vsub.s32 2, %v607_v0 }
  0x69   : > { %1403 = vmatprep.subr.bf16.mxu0 %v1402_v21 }
  0x6c   : > { %1405 = vmatpush3.bf16.msra.mxu0 %v1402_v21 }
  0x6d   : > { %1407 = vmatprep.subr.bf16.mxu0 %v1406_v24 }
  0x70   : > { %1409 = vmatpush3.bf16.msra.mxu0 %v1406_v24 }
  0x73   : > { %1341 = vmatmul.mubr.f32.vlgmr.msra.gmra.mrb[0].mxu0 %v1909_v25 }
 0x146   : > { %v1342_v27 = vpop.f32.mrb[0].mxu0 }
 0x147   : > { %v557_v29 = vadd.f32 %v1342_v27, %v1264_v26  ;;  %v551_v30 = vpop.f32.mrb[1].mxu0 }
 0x148   : > { %v552_v31 = vadd.f32 %v1264_v26, %v551_v30  ;;  %v612_v26 = vld [vmem:[%s2267_s7] sm:$0x1] }
 0x149   : > { %vm561_vm0 = vcmp.gt.f32.partialorder %v557_v29, 0.0  ;;  %v564_v32 = vmul.f32 %v562_v28, %v557_v29 }
 0x14a   : > { %vm560_vm1 = vcmp.gt.f32.partialorder %v552_v31, 0.0  ;;  %v563_v33 = vmul.f32 %v562_v28, %v552_v31 }
 0x14b   : > { %v1917_v34 = vsel %vm561_vm0, %v557_v29, %v564_v32 }
 0x14c   : > { %v1919_v35 = vsel %vm560_vm1, %v552_v31, %v563_v33  ;;  %v579_v38 = vmul.f32 %v1917_v34, %v1917_v34  ;;  %v668_v3 = vcombine.high %v1917_v34, %v1917_v34  ;;  %v630_v19 = vrot.slane %v1917_v34, 7 }
 0x14d   : > { %v567_v36 = vadd.f32 %v1917_v34, %v1919_v35  ;;  %v578_v37 = vmul.f32 %v1919_v35, %v1919_v35  ;;  %v629_v20 = vrot.slane %v1919_v35, 7  ;;  %v645_v23 = vrot.slane %v1917_v34, 1 }
 0x14e   : > { %v675_v14 = vrot.slane %v668_v3, %v674_v6  ;;  %v644_v24 = vrot.slane %v1919_v35, 1 }
 0x14f   : > { %568 = vadd.xlane.f32.xlu0 %v567_v36  ;;  %v580_v39 = vadd.f32 %v579_v38, %v578_v37  ;;  %v634_v32 = vsel %vm633_vm3, %v629_v20, %v630_v19  ;;  %v635_v33 = vsel %vm633_vm3, %v630_v19, %v629_v20 }
 0x150   : > { %v676_v27 = vcombine.high %v675_v14, %v675_v14 }
 0x153   : > { %581 = vadd.xlane.f32.xlu0 %v580_v39 }
 0x1dc   : > { %v569_v40 = vpop.xlane.xlu0 %568 }
 0x1dd   : > { %v570_v41 = vrot.slane %v569_v40, 4 }
 0x1df   : > { %v571_v42 = vadd.f32 %v570_v41, %v569_v40  ;;  %v647_v40 = vsel %vm646_vm4, %v644_v24, %v645_v23 }
 0x1e0   : > { %v582_v43 = vpop.xlane.xlu0 %581 }
 0x1e1   : > { %v572_v44 = vrot.slane %v571_v42, 2  ;;  %v583_v45 = vrot.slane %v582_v43, 4 }
 0x1e3   : > { %v584_v46 = vadd.f32 %v583_v45, %v582_v43  ;;  %v573_v47 = vadd.f32 %v572_v44, %v571_v42  ;;  %v648_v43 = vsel %vm646_vm4, %v645_v23, %v644_v24 }
 0x1e5   : > { %v585_v48 = vrot.slane %v584_v46, 2  ;;  %v574_v49 = vrot.slane %v573_v47, 1 }
 0x1e7   : > { %v575_v50 = vadd.f32 %v574_v49, %v573_v47  ;;  %v586_v51 = vadd.f32 %v585_v48, %v584_v46  ;;  %v683_v46 = vrot.slane %v676_v27, %v674_v6 }
 0x1e9   : > { %1442 = vpush %v575_v50  ;;  %v587_v52 = vrot.slane %v586_v51, 1 }
 0x1eb   : > { %v588_v53 = vadd.f32 %v587_v52, %v586_v51 }
 0x1ed   : > { %1444 = vpush %v588_v53 }
 0x21a   : > { %s1443_s20 = spop %1442 }
 0x21b   : > { %s1927_s12 = smul.f32 0.001953125, %s1443_s20 }
 0x21d   : > { %s591_s13 = smul.f32 %s1927_s12, %s1927_s12  ;;  %v601_v11 = vstv %s1927_s12 }
 0x21e   : > { %s1445_s17 = spop %1444 }
 0x21f   : > { %s590_s27 = smul.f32 0.001953125, %s1445_s17 }
 0x221   : > { %s592_s24 = ssub.f32 %s590_s27, %s591_s13  ;;  %s1263_s13 = sld [smem:[#allocation3 + $0x1]] }
 0x223   : > { %s594_s30 = sadd.f32 1e-06, %s592_s24 }
 0x225   : > { %v595_v54 = vstv %s594_s30 }
 0x226   : > { %1519 = vrsqrt.f32 %v595_v54 }
 0x227   : > { %v711_v1 = vstv %s1263_s13 }
 0x230   : > { %v1520_v55 = vpop.eup %1519 }
 0x231   : > { %1446 = vpush %v1520_v55 }
 0x262   : > { %s1447_s14 = spop %1446 }
 0x263   : > { %v598_v8 = vstv %s1447_s14 }
 0x264   : > { %v599_v10 = vmul.f32 %v598_v8, %v593_v4 }
 0x266   : > { %v602_v15 = vmul.f32 %v601_v11, %v599_v10  ;;  %v609_v16 = vrot.slane %v599_v10, %v1942_v7  ;;  %v692_v42 = vmul.f32 %v599_v10, %v1919_v35 }
 0x268   : > { %v603_v21 = vsub.f32 %v600_v12, %v602_v15  ;;  %v611_v22 = vmul.f32 %v609_v16, %v1934_v56 }
 0x26a   : > { %v621_v28 = vmul.f32 %v620_v13, %v603_v21  ;;  %v626_v29 = vrot.slane %v611_v22, %v625_v17  ;;  %v639_v30 = vrot.slane %v611_v22, %v1942_v7  ;;  %v652_v31 = vrot.slane %v611_v22, %v651_v18 }
 0x26b   : > { %v693_v49 = vadd.f32 %v692_v42, %v603_v21  ;;  %v745_v42 = vld [vmem:[%s2268_s8 + $0x18] sm:$0xff] }
 0x26c   : > { %v622_v36 = vadd.f32 %v621_v28, %v612_v26  ;;  %v627_v37 = vmul.f32 %v626_v29, %v1919_v35  ;;  %v628_v38 = vmul.f32 %v626_v29, %v1917_v34  ;;  %v640_v39 = vmul.f32 %v639_v30, %v635_v33 }
 0x26d   : > { %v641_v41 = vmul.f32 %v639_v30, %v634_v32  ;;  %v653_v45 = vmul.f32 %v652_v31, %v647_v40  ;;  %v654_v48 = vmul.f32 %v652_v31, %v648_v43  ;;  %v684_v34 = vcombine.high %v683_v46, %v683_v46  ;;  %v743_v31 = vld [vmem:[%s2268_s8 + $0x8] sm:$0xff]  ;;  %v742_v32 = vld [vmem:[%s2268_s8] sm:$0xff]  ;;  %v753_v43 = vld [vmem:[%s2268_s8 + $0x58] sm:$0xff] }
 0x26e   : > { %v642_v44 = vadd.f32 %v640_v39, %v627_v37  ;;  %v661_v51 = vrot.slane %v622_v36, %v1942_v7  ;;  %v698_v55 = vrot.slane %v693_v49, %v1942_v7  ;;  %v751_v39 = vld [vmem:[%s2268_s8 + $0x48] sm:$0xff]  ;;  %v746_v46 = vld [vmem:[%s2268_s8 + $0x20] sm:$0xff] }
 0x26f   : > { %v643_v47 = vadd.f32 %v641_v41, %v628_v38  ;;  %v686_v57 = vmul.f32 %v684_v34, %v599_v10  ;;  %v744_v38 = vld [vmem:[%s2268_s8 + $0x10] sm:$0xff] }
 0x270   : > { %v655_v50 = vadd.f32 %v653_v45, %v642_v44  ;;  %v700_v58 = vmul.f32 %v698_v55, %v1934_v56  ;;  %v748_v55 = vld [vmem:[%s2268_s8 + $0x30] sm:$0xff] }
 0x271   : > { %v656_v52 = vadd.f32 %v654_v48, %v643_v47  ;;  %v687_v35 = vadd.f32 %v686_v57, %v603_v21  ;;  %v1643_v21 = vmov 0   ;;  %v755_v47 = vld [vmem:[%s2268_s8 + $0x68] sm:$0xff] }
 0x272   : > { %v663_v53 = vadd.f32 %v661_v51, %v655_v50  ;;  %v703_v61 = vrot.slane %v700_v58, 2  ;;  %1518 = vset.pattern.permute.xlu1 %v1643_v21  ;;  %1517 = vset.pattern.permute.xlu0 %v1643_v21  ;;  %v747_v50 = vld [vmem:[%s2268_s8 + $0x28] sm:$0xff] }
 0x273   : > { %v664_v54 = vadd.f32 %v661_v51, %v656_v52  ;;  %v688_v59 = vmul.f32 %v687_v35, %v1934_v56  ;;  %v757_v51 = vld [vmem:[%s2268_s8 + $0x78] sm:$0xff]  ;;  %v780_v57 = vld [vmem:[%s2269_s9 + $0x8] sm:$0xff] }
 0x274   : > { %665 = vst [vmem:[#allocation2] sm:$0xff] %v663_v53 }
 0x275   : > { %666 = vst [vmem:[#allocation2 + $0x8] sm:$0xff] %v664_v54 }
 0x27b   : > { %v689_v60 = vld [vmem:[#allocation2] sm:$0x1] }
 0x27c   : > { %v690_v62 = vsub.f32 %v689_v60, %v688_v59  ;;  %v701_v63 = vld [vmem:[#allocation2 + $0xf] sm:$0x1]  ;;  %v749_v60 = vld [vmem:[%s2268_s8 + $0x38] sm:$0xff] }
 0x27d   : > { %v705_v0 = vsub.f32 %v701_v63, %v703_v61  ;;  %v782_v61 = vld [vmem:[%s2269_s9 + $0x18] sm:$0xff] }
 0x27e   : > { %691 = vst [vmem:[#allocation2] sm:$0x1] %v690_v62 }
 0x27f   : > { %706 = vst [vmem:[#allocation2 + $0xf] sm:$0x1] %v705_v0 }
 0x285   : > { %v707_v2 = vld [vmem:[#allocation2] sm:$0xff] }
 0x286   : > { %vm709_vm5 = vcmp.gt.f32.partialorder %v707_v2, 0.0  ;;  %v712_v3 = vmul.f32 %v711_v1, %v707_v2  ;;  %v708_v4 = vld [vmem:[#allocation2 + $0x8] sm:$0xff] }
 0x287   : > { %vm710_vm6 = vcmp.gt.f32.partialorder %v708_v4, 0.0  ;;  %v713_v5 = vmul.f32 %v711_v1, %v708_v4  ;;  %v750_v1 = vld [vmem:[%s2268_s8 + $0x40] sm:$0xff] }
 0x288   : > { %v714_v6 = vsel %vm709_vm5, %v707_v2, %v712_v3  ;;  %v784_v2 = vld [vmem:[%s2269_s9 + $0x28] sm:$0xff] }
 0x289   : > { %1375 = vmatprep.mubr.f32.mxu1 %v714_v6  ;;  %v1967_v8 = vsel %vm710_vm6, %v708_v4, %v713_v5  ;;  %v727_v10 = vmul.f32 %v714_v6, %v714_v6 }
 0x28a   : > { %v716_v56 = vadd.f32 %v1967_v8, %v714_v6  ;;  %v728_v11 = vmul.f32 %v1967_v8, %v1967_v8  ;;  %v752_v6 = vld [vmem:[%s2268_s8 + $0x50] sm:$0xff] }
 0x28c   : > { %717 = vadd.xlane.f32.xlu1 %v716_v56  ;;  %v729_v12 = vadd.f32 %v728_v11, %v727_v10  ;;  %v786_v56 = vld [vmem:[%s2269_s9 + $0x38] sm:$0xff] }
 0x290   : > { %730 = vadd.xlane.f32.xlu1 %v729_v12 }
 0x319   : > { %v718_v13 = vpop.xlane.xlu1 %717 }
 0x31a   : > { %v719_v14 = vrot.slane %v718_v13, 4 }
 0x31c   : > { %v720_v15 = vadd.f32 %v719_v14, %v718_v13  ;;  %v754_v13 = vld [vmem:[%s2268_s8 + $0x60] sm:$0xff]  ;;  %v788_v14 = vld [vmem:[%s2269_s9 + $0x48] sm:$0xff] }
 0x31d   : > { %v731_v16 = vpop.xlane.xlu1 %730 }
 0x31e   : > { %v721_v17 = vrot.slane %v720_v15, 2  ;;  %v732_v18 = vrot.slane %v731_v16, 4 }
 0x320   : > { %v733_v19 = vadd.f32 %v732_v18, %v731_v16  ;;  %v722_v20 = vadd.f32 %v721_v17, %v720_v15  ;;  %v756_v18 = vld [vmem:[%s2268_s8 + $0x70] sm:$0xff] }
 0x322   : > { %v734_v22 = vrot.slane %v733_v19, 2  ;;  %v723_v23 = vrot.slane %v722_v20, 1 }
 0x324   : > { %v724_v24 = vadd.f32 %v723_v23, %v722_v20  ;;  %v735_v26 = vadd.f32 %v734_v22, %v733_v19  ;;  %v790_v19 = vld [vmem:[%s2269_s9 + $0x58] sm:$0xff] }
 0x326   : > { %1448 = vpush %v724_v24  ;;  %v736_v27 = vrot.slane %v735_v26, 1  ;;  %v792_v24 = vld [vmem:[%s2269_s9 + $0x68] sm:$0xff] }
 0x328   : > { %v737_v28 = vadd.f32 %v736_v27, %v735_v26  ;;  %v779_v26 = vld [vmem:[%s2269_s9] sm:$0xff] }
 0x32a   : > { %1450 = vpush %v737_v28 }
 0x357   : > { %s1449_s17 = spop %1448 }
 0x358   : > { %s1972_s27 = smul.f32 0.001953125, %s1449_s17  ;;  %s2300_s17 = sld [smem:[#allocation18_spill]] }
 0x35a   : > { %s740_s24 = smul.f32 %s1972_s27, %s1972_s27  ;;  %v2026_v52 = vstv %s1972_s27 }
 0x35b   : > { %s1451_s30 = spop %1450 }
 0x35c   : > { %s739_s28 = smul.f32 0.001953125, %s1451_s30  ;;  %s1566_s30 = scalar_lea.vmem %s2209_s16, 256 }
 0x35d   : > { %p1567_p13 = scmp.ne.s32.totalorder %s2209_s16, %s1566_s30 }
 0x35e   : > { %s741_s18 = ssub.f32 %s739_s28, %s740_s24  ;;  %s1145_s24 = scalar_lea.sflag [#allocation5], %s1844_s21 }
 0x35f   : > { %p1568_p3 = pnand %p1567_p13, %p2301_p7 }
 0x360   : > { %s758_s26 = sadd.f32 1e-06, %s741_s18 }
 0x361   : > { %p1569_p6 = pneg %p1568_p3 }
 0x362   : > { %v759_v29 = vstv %s758_s26 }
 0x363   : > { %1521 = vrsqrt.f32 %v759_v29 }
 0x36d   : > { %v1522_v30 = vpop.eup %1521 }
 0x36e   : > { %1452 = vpush %v1522_v30 }
 0x39f   : > { %s1453_s20 = spop %1452 }
 0x3a0   : > { %v1982_v33 = vstv %s1453_s20  ;;  %s1271_s20 = sshll.u32 %s1733_s25, 8  ;;  %s1644_s25 = smov [#allocation8]  }
 0x3a1   : > { %v764_v36 = vmul.f32 %v1982_v33, %v743_v31  ;;  %v1986_v37 = vmul.f32 %v1982_v33, %v742_v32  ;;  %v1996_v40 = vmul.f32 %v1982_v33, %v744_v38  ;;  %v772_v41 = vmul.f32 %v1982_v33, %v751_v39  ;;  %v794_v31 = vld [vmem:[%s2269_s9 + $0x78] sm:$0xff]  ;;  %v781_v32 = vld [vmem:[%s2269_s9 + $0x10] sm:$0xff]  ;;  %v783_v38 = vld [vmem:[%s2269_s9 + $0x20] sm:$0xff]  ;;  %s2216_s19 = scalar_lea.hbm %s2300_s17, %s1271_s20  ;;  %s1570_s28 = sshll.u32 %s1644_s25, 4  ;;  %s1571_s28 = int_to_ptr.vmem [resolvable:$false] %s1570_s28 }
 0x3a2   : > { %v766_v44 = vmul.f32 %v1982_v33, %v745_v42  ;;  %v774_v45 = vmul.f32 %v1982_v33, %v753_v43  ;;  %v2015_v48 = vmul.f32 %v1982_v33, %v746_v46  ;;  %v776_v49 = vmul.f32 %v1982_v33, %v755_v47  ;;  %v789_v47 = vld [vmem:[%s2269_s9 + $0x50] sm:$0xff]  ;;  %s1572_s18 = scalar_lea.vmem %s1571_s28, 512  ;;  %p1573_p4 = scmp.lt.s32.totalorder %s2209_s16, %s1571_s28 }
 0x3a3   : > { %851 = vperm.xlu1 %1518, %v764_v36   ;;  %846 = vperm.xlu0 %1517, %v1986_v37   ;;  %v768_v53 = vmul.f32 %v1982_v33, %v747_v50  ;;  %v778_v34 = vmul.f32 %v1982_v33, %v757_v51  ;;  %v797_v54 = vmul.f32 %v2026_v52, %v764_v36  ;;  %v791_v50 = vld [vmem:[%s2269_s9 + $0x60] sm:$0xff]  ;;  %p1574_p5 = scmp.lt.s32.totalorder %s1572_s18, %s1566_s30 }
 0x3a4   : > { %v769_v35 = vmul.f32 %v1982_v33, %v748_v55  ;;  %v799_v59 = vmul.f32 %v2026_v52, %v766_v44  ;;  %v770_v62 = vmul.f32 %v1982_v33, %v749_v60  ;;  %v771_v3 = vmul.f32 %v1982_v33, %v750_v1  ;;  %v2124_v55 = vld [vmem:[%s2270_s10 + $0x8] sm:$0xff] }
 0x3a5   : > { %v813_v58 = vsub.f32 %v780_v57, %v797_v54  ;;  %v801_v0 = vmul.f32 %v2026_v52, %v768_v53  ;;  %v773_v10 = vmul.f32 %v1982_v33, %v752_v6  ;;  %v805_v12 = vmul.f32 %v2026_v52, %v772_v41  ;;  %v2129_v57 = vld [vmem:[%s2270_s10] sm:$0xff]  ;;  %p1575_p0 = por %p1574_p5, %p1573_p4 }
 0x3a6   : > { %v815_v63 = vsub.f32 %v782_v61, %v799_v59  ;;  %v803_v5 = vmul.f32 %v2026_v52, %v770_v62  ;;  %v775_v15 = vmul.f32 %v1982_v33, %v754_v13  ;;  %v807_v17 = vmul.f32 %v2026_v52, %v774_v45 }
 0x3a7   : > { %856 = vperm.xlu1 %1518, %v1996_v40   ;;  %891 = vperm.xlu0 %1517, %v772_v41   ;;  %v817_v4 = vsub.f32 %v784_v2, %v801_v0  ;;  %v821_v16 = vsub.f32 %v788_v14, %v805_v12  ;;  %v777_v20 = vmul.f32 %v1982_v33, %v756_v18  ;;  %v785_v41 = vld [vmem:[%s2269_s9 + $0x30] sm:$0xff]  ;;  %v2141_v0 = vld [vmem:[%s2270_s10 + $0x18] sm:$0xff]  ;;  %p1576_p8 = pnand %p1575_p0, %p1569_p6 }
 0x3a8   : > { %v819_v11 = vsub.f32 %v786_v56, %v803_v5  ;;  %v823_v21 = vsub.f32 %v790_v19, %v807_v17  ;;  %v809_v22 = vmul.f32 %v2026_v52, %v776_v49  ;;  %v796_v23 = vmul.f32 %v2026_v52, %v1986_v37  ;;  %v2148_v56 = vld [vmem:[%s2270_s10 + $0x20] sm:$0xff]  ;;  %v2160_v17 = vld [vmem:[%s2270_s10 + $0x30] sm:$0xff]  ;;  %v835_v18 = vld [vmem:[%s2270_s10 + $0x38] sm:$0xff] }
 0x3a9   : > { %v811_v29 = vmul.f32 %v2026_v52, %v778_v34  ;;  %v798_v30 = vmul.f32 %v2026_v52, %v1996_v40  ;;  %v800_v37 = vmul.f32 %v2026_v52, %v2015_v48  ;;  %v802_v40 = vmul.f32 %v2026_v52, %v769_v35 }
 0x3aa   : > { %v825_v27 = vsub.f32 %v792_v24, %v809_v22  ;;  %v812_v28 = vsub.f32 %v779_v26, %v796_v23  ;;  %v804_v43 = vmul.f32 %v2026_v52, %v771_v3  ;;  %v806_v46 = vmul.f32 %v2026_v52, %v773_v10  ;;  %v2169_v23 = vld [vmem:[%s2270_s10 + $0x48] sm:$0xff]  ;;  %v836_v24 = vld [vmem:[%s2270_s10 + $0x40] sm:$0xff] }
 0x3ab   : > { %861 = vperm.xlu1 %1518, %v766_v44   ;;  %901 = vperm.xlu0 %1517, %v774_v45   ;;  %v827_v33 = vsub.f32 %v794_v31, %v811_v29  ;;  %v814_v36 = vsub.f32 %v781_v32, %v798_v30  ;;  %v816_v39 = vsub.f32 %v783_v38, %v800_v37  ;;  %v787_v44 = vld [vmem:[%s2269_s9 + $0x40] sm:$0xff]  ;;  %v839_v30 = vld [vmem:[%s2270_s10 + $0x58] sm:$0xff]  ;;  %v838_v32 = vld [vmem:[%s2270_s10 + $0x50] sm:$0xff] }
 0x3ac   : > { %v818_v42 = vsub.f32 %v785_v41, %v802_v40  ;;  %v820_v45 = vsub.f32 %v787_v44, %v804_v43  ;;  %v840_v40 = vld [vmem:[%s2270_s10 + $0x60] sm:$0xff] }
 0x3af   : > { %866 = vperm.xlu1 %1518, %v2015_v48   ;;  %911 = vperm.xlu0 %1517, %v776_v49   ;;  %v822_v48 = vsub.f32 %v789_v47, %v806_v46  ;;  %v808_v49 = vmul.f32 %v2026_v52, %v775_v15  ;;  %v843_v46 = vld [vmem:[%s2270_s10 + $0x78] sm:$0xff]  ;;  %v842_v47 = vld [vmem:[%s2270_s10 + $0x70] sm:$0xff] }
 0x3b1   : > { %v824_v51 = vsub.f32 %v791_v50, %v808_v49 }
 0x3b3   : > { %871 = vperm.xlu1 %1518, %v768_v53   ;;  %921 = vperm.xlu0 %1517, %v778_v34   ;;  %v810_v53 = vmul.f32 %v2026_v52, %v777_v20  ;;  %v793_v34 = vld [vmem:[%s2269_s9 + $0x70] sm:$0xff] }
 0x3b5   : > { %v826_v54 = vsub.f32 %v793_v34, %v810_v53 }
 0x3b7   : > { %876 = vperm.xlu1 %1518, %v769_v35   ;;  %948 = vperm.xlu0 %1517, %v813_v58  }
 0x3bb   : > { %881 = vperm.xlu1 %1518, %v770_v62   ;;  %958 = vperm.xlu0 %1517, %v815_v63   ;;  %v2136_v62 = vld [vmem:[%s2270_s10 + $0x10] sm:$0xff] }
 0x3bf   : > { %886 = vperm.xlu1 %1518, %v771_v3   ;;  %968 = vperm.xlu0 %1517, %v817_v4  }
 0x3c3   : > { %896 = vperm.xlu1 %1518, %v773_v10   ;;  %978 = vperm.xlu0 %1517, %v819_v11   ;;  %v2153_v10 = vld [vmem:[%s2270_s10 + $0x28] sm:$0xff] }
 0x3c7   : > { %906 = vperm.xlu1 %1518, %v775_v15   ;;  %988 = vperm.xlu0 %1517, %v821_v16  }
 0x3cb   : > { %916 = vperm.xlu1 %1518, %v777_v20   ;;  %998 = vperm.xlu0 %1517, %v823_v21  }
 0x3cf   : > { %1008 = vperm.xlu0 %1517, %v825_v27   ;;  %943 = vperm.xlu1 %1518, %v812_v28  }
 0x3d3   : > { %1018 = vperm.xlu0 %1517, %v827_v33   ;;  %953 = vperm.xlu1 %1518, %v814_v36  }
 0x3d7   : > { %963 = vperm.xlu1 %1518, %v816_v39   ;;  %v841_v39 = vld [vmem:[%s2270_s10 + $0x68] sm:$0xff] }
 0x3db   : > { %973 = vperm.xlu1 %1518, %v818_v42  }
 0x3df   : > { %983 = vperm.xlu1 %1518, %v820_v45  }
 0x3e3   : > { %993 = vperm.xlu1 %1518, %v822_v48  }
 0x3e7   : > { %1003 = vperm.xlu1 %1518, %v824_v51  }
 0x3eb   : > { %1013 = vperm.xlu1 %1518, %v826_v54  }
 0x422   : > { %v852_v35 = vpop.permute.xlu1 %851  ;;  %v847_v58 = vpop.permute.xlu0 %846 }
 0x423   : > { %v925_v52 = vmul.f32 %v852_v35, %v2124_v55  ;;  %v924_v59 = vmul.f32 %v847_v58, %v2129_v57 }
 0x425   : > { %v1410_v60 = vpack.c.bf16 %v925_v52, %v924_v59 }
 0x426   : > { %v857_v61 = vpop.permute.xlu1 %856  ;;  %v892_v63 = vpop.permute.xlu0 %891 }
 0x427   : > { %1411 = vmatprep.subr.bf16.mxu1 %v1410_v60  ;;  %v926_v2 = vmul.f32 %v857_v61, %v2136_v62  ;;  %v933_v28 = vmul.f32 %v892_v63, %v2169_v23 }
 0x428   : > { %1413 = vmatpush3.bf16.msra.mxu1 %v1410_v60 }
 0x42a   : > { %v862_v1 = vpop.permute.xlu1 %861  ;;  %v902_v5 = vpop.permute.xlu0 %901 }
 0x42b   : > { %v927_v3 = vmul.f32 %v862_v1, %v2141_v0  ;;  %v935_v37 = vmul.f32 %v902_v5, %v839_v30 }
 0x42d   : > { %v1414_v4 = vpack.c.bf16 %v927_v3, %v926_v2 }
 0x42e   : > { %v867_v6 = vpop.permute.xlu1 %866  ;;  %v912_v14 = vpop.permute.xlu0 %911 }
 0x42f   : > { %1415 = vmatprep.subr.bf16.mxu1 %v1414_v4  ;;  %v928_v12 = vmul.f32 %v867_v6, %v2148_v56  ;;  %v937_v44 = vmul.f32 %v912_v14, %v841_v39 }
 0x430   : > { %1417 = vmatpush3.bf16.msra.mxu1 %v1414_v4 }
 0x432   : > { %v872_v11 = vpop.permute.xlu1 %871  ;;  %v922_v19 = vpop.permute.xlu0 %921 }
 0x433   : > { %v929_v13 = vmul.f32 %v872_v11, %v2153_v10  ;;  %v939_v50 = vmul.f32 %v922_v19, %v843_v46 }
 0x435   : > { %v1418_v15 = vpack.c.bf16 %v929_v13, %v928_v12 }
 0x436   : > { %v877_v16 = vpop.permute.xlu1 %876  ;;  %v949_v31 = vpop.permute.xlu0 %948 }
 0x437   : > { %1419 = vmatprep.subr.bf16.mxu1 %v1418_v15  ;;  %v930_v21 = vmul.f32 %v877_v16, %v2160_v17  ;;  %v1022_v35 = vmul.f32 %v949_v31, %v2124_v55 }
 0x438   : > { %1421 = vmatpush3.bf16.msra.mxu1 %v1418_v15 }
 0x43a   : > { %v882_v20 = vpop.permute.xlu1 %881  ;;  %v959_v42 = vpop.permute.xlu0 %958 }
 0x43b   : > { %v931_v22 = vmul.f32 %v882_v20, %v835_v18  ;;  %v1024_v63 = vmul.f32 %v959_v42, %v2141_v0 }
 0x43d   : > { %v1422_v26 = vpack.c.bf16 %v931_v22, %v930_v21 }
 0x43e   : > { %v887_v27 = vpop.permute.xlu1 %886  ;;  %v969_v53 = vpop.permute.xlu0 %968 }
 0x43f   : > { %v932_v29 = vmul.f32 %v887_v27, %v836_v24  ;;  %1423 = vmatprep.subr.bf16.mxu1 %v1422_v26  ;;  %v1026_v55 = vmul.f32 %v969_v53, %v2153_v10 }
 0x440   : > { %1425 = vmatpush3.bf16.msra.mxu1 %v1422_v26 }
 0x441   : > { %v1426_v33 = vpack.c.bf16 %v933_v28, %v932_v29 }
 0x442   : > { %v897_v36 = vpop.permute.xlu1 %896  ;;  %v979_v59 = vpop.permute.xlu0 %978 }
 0x443   : > { %v934_v38 = vmul.f32 %v897_v36, %v838_v32  ;;  %1427 = vmatprep.subr.bf16.mxu1 %v1426_v33  ;;  %v1028_v13 = vmul.f32 %v979_v59, %v835_v18 }
 0x444   : > { %1429 = vmatpush3.bf16.msra.mxu1 %v1426_v33 }
 0x445   : > { %v1430_v41 = vpack.c.bf16 %v935_v37, %v934_v38 }
 0x446   : > { %v907_v43 = vpop.permute.xlu1 %906  ;;  %v989_v5 = vpop.permute.xlu0 %988 }
 0x447   : > { %v936_v45 = vmul.f32 %v907_v43, %v840_v40  ;;  %1431 = vmatprep.subr.bf16.mxu1 %v1430_v41  ;;  %v1030_v0 = vmul.f32 %v989_v5, %v2169_v23 }
 0x448   : > { %1433 = vmatpush3.bf16.msra.mxu1 %v1430_v41 }
 0x449   : > { %v1434_v48 = vpack.c.bf16 %v937_v44, %v936_v45 }
 0x44a   : > { %v917_v49 = vpop.permute.xlu1 %916 }
 0x44b   : > { %v938_v51 = vmul.f32 %v917_v49, %v842_v47  ;;  %1435 = vmatprep.subr.bf16.mxu1 %v1434_v48 }
 0x44c   : > { %1437 = vmatpush3.bf16.msra.mxu1 %v1434_v48 }
 0x44d   : > { %v1438_v34 = vpack.c.bf16 %v939_v50, %v938_v51 }
 0x44e   : > { %v944_v54 = vpop.permute.xlu1 %943 }
 0x44f   : > { %v1021_v58 = vmul.f32 %v944_v54, %v2129_v57  ;;  %1439 = vmatprep.subr.bf16.mxu1 %v1438_v34 }
 0x450   : > { %1441 = vmatpush3.bf16.msra.mxu1 %v1438_v34 }
 0x451   : > { %v1037_v52 = vadd.f32 %v1022_v35, %v1021_v58 }
 0x452   : > { %v954_v60 = vpop.permute.xlu1 %953 }
 0x453   : > { %v1023_v61 = vmul.f32 %v954_v60, %v2136_v62  ;;  %1376 = vmatmul.mubr.f32.vlgmr.msra.gmra.mrb[0].mxu1 %v1967_v8  ;;  %v999_v62 = vpop.permute.xlu0 %998 }
 0x454   : > { %v1032_v26 = vmul.f32 %v999_v62, %v839_v30 }
 0x455   : > { %v1038_v1 = vadd.f32 %v1037_v52, %v1023_v61 }
 0x456   : > { %v964_v2 = vpop.permute.xlu1 %963 }
 0x457   : > { %v1039_v3 = vadd.f32 %v1038_v1, %v1024_v63  ;;  %v1025_v4 = vmul.f32 %v964_v2, %v2148_v56  ;;  %v1009_v22 = vpop.permute.xlu0 %1008 }
 0x458   : > { %v1034_v31 = vmul.f32 %v1009_v22, %v841_v39  ;;  %v940_v39 = vld [vmem:[%s2271_s11] sm:$0x1] }
 0x459   : > { %v1040_v57 = vadd.f32 %v1039_v3, %v1025_v4 }
 0x45a   : > { %v974_v6 = vpop.permute.xlu1 %973 }
 0x45b   : > { %v1041_v11 = vadd.f32 %v1040_v57, %v1026_v55  ;;  %v1027_v12 = vmul.f32 %v974_v6, %v2160_v17  ;;  %v1019_v18 = vpop.permute.xlu0 %1018 }
 0x45d   : > { %v1042_v14 = vadd.f32 %v1041_v11, %v1027_v12 }
 0x45e   : > { %v984_v15 = vpop.permute.xlu1 %983 }
 0x45f   : > { %v1043_v8 = vadd.f32 %v1042_v14, %v1028_v13  ;;  %v1029_v16 = vmul.f32 %v984_v15, %v836_v24  ;;  %v1036_v24 = vmul.f32 %v1019_v18, %v843_v46 }
 0x461   : > { %v1044_v19 = vadd.f32 %v1043_v8, %v1029_v16 }
 0x462   : > { %v994_v20 = vpop.permute.xlu1 %993 }
 0x463   : > { %v1045_v21 = vadd.f32 %v1044_v19, %v1030_v0  ;;  %v1031_v56 = vmul.f32 %v994_v20, %v838_v32 }
 0x465   : > { %v1046_v10 = vadd.f32 %v1045_v21, %v1031_v56 }
 0x466   : > { %v1004_v27 = vpop.permute.xlu1 %1003 }
 0x467   : > { %v1047_v28 = vadd.f32 %v1046_v10, %v1032_v26  ;;  %v1033_v29 = vmul.f32 %v1004_v27, %v840_v40 }
 0x469   : > { %v1048_v17 = vadd.f32 %v1047_v28, %v1033_v29 }
 0x46a   : > { %v1014_v33 = vpop.permute.xlu1 %1013 }
 0x46b   : > { %v1049_v36 = vadd.f32 %v1048_v17, %v1034_v31  ;;  %v1035_v37 = vmul.f32 %v1014_v33, %v842_v47 }
 0x46d   : > { %v1050_v38 = vadd.f32 %v1049_v36, %v1035_v37 }
 0x46f   : > { %v1051_v23 = vadd.f32 %v1050_v38, %v1036_v24 }
 0x471   : > { %v1052_v41 = vrot.slane %v1051_v23, 4 }
 0x473   : > { %v1053_v42 = vadd.f32 %v1052_v41, %v1051_v23 }
 0x475   : > { %v1054_v32 = vrot.slane %v1053_v42, 2 }
 0x477   : > { %v1055_v43 = vadd.f32 %v1054_v32, %v1053_v42 }
 0x479   : > { %v1056_v30 = vrot.slane %v1055_v43, 1 }
 0x47b   : > { %v1057_v44 = vadd.f32 %v1056_v30, %v1055_v43 }
 0x47d   : > { %v1058_v40 = vadd.f32 %v1057_v44, %v940_v39 }
 0x47f   : > { %v1063_v45 = vrot.slane %v1058_v40, %v1942_v7 }
 0x526   : > { %v1377_v46 = vpop.f32.mrb[0].mxu1 }
 0x527   : > { %v1137_v47 = vadd.f32 %v1377_v46, %v1063_v45  ;;  %v1131_v48 = vpop.f32.mrb[1].mxu1 }
 0x528   : > { %v1132_v49 = vadd.f32 %v1131_v48, %v1063_v45 }
 0x529   : > { %v1141_v50 = vadd.f32 %v1137_v47, %v1909_v25 }
 0x52a   : > { %v1140_v51 = vadd.f32 %v1132_v49, %v1875_v9 }
 0x52b   : > { %1143 = vst [vmem:[%s454_s23 + $0x8] sm:$0xff] %v1141_v50 }
 0x52c   : > { %1142 = vst [vmem:[%s454_s23] sm:$0xff] %v1140_v51 }
 0x52d   : > { %1579 = shalt.err (!%p1576_p8)
}
 0x52e   : > { %s1580_s27 = scalar_lea.hbm %s2216_s19, 256  ;;  %s1584_s14 = scalar_lea.hbm %s2300_s17, 512 }
 0x52f   : > { %p1581_p9 = scmp.ne.s32.totalorder %s2216_s19, %s1580_s27  ;;  %p1585_p2 = scmp.lt.u32.totalorder %s2216_s19, %s2300_s17 }
 0x530   : > { %p1586_p11 = scmp.lt.u32.totalorder %s1584_s14, %s1580_s27  ;;  %p1588_p13 = scmp.lt.u32.totalorder %s1580_s27, %s2216_s19 }
 0x531   : > { %p1582_p10 = pnand %p1581_p9, %p2301_p7 }
 0x532   : > { %p1587_p12 = por %p1586_p11, %p1585_p2 }
 0x533   : > { %p1583_p1 = pneg %p1582_p10 }
 0x534   : > { %p1589_p3 = por %p1588_p13, %p1587_p12 }
 0x536   : > { %p1590_p6 = pnand %p1589_p3, %p1583_p1 }
 0x538   : > { %1593 = shalt.err (!%p1590_p6)
}
 0x539   : > { %s1645_s12 = smov 128   ;;  %s1646_s13 = smov 8  }
 0x53a   : > { %1460 = dma.vmem_to_hbm [thread:$0]  (%p2301_p7), %s2209_s16, 256, %s2216_s19, %s1145_s24, %s1645_s12, %s1645_s12, %s1646_s13  }
 0x53b PF: > { %s2302_s30 = sld [smem:[#allocation12_spill]]  ;;  %s2303_s25 = sld [smem:[#allocation17_spill]] }
 0x53c   : > { %s2304_s28 = sld [smem:[#allocation14_spill]] }
 0x541   : > { %s1173_s18 = sand.u32 1, %s2302_s30   ;;  %p2305_p4 = scmp.ne.s32.totalorder %s2303_s25, 0 }
 0x542   : > { %p2306_p5 = scmp.ge.s32.totalorder %s2304_s28, 2  ;;  %s1174_s27 = scalar_lea.sflag [#allocation5], %s1173_s18 }
 0x544   : > { %p1471_p0 = pnand %p2306_p5, %p2305_p4 }
 0x546   : > { %1619 = dma.done.wait (!%p1471_p0), %s1174_s27, 256  }
 0x547   : > { %1621 = vsyncadd (!%p1471_p0), %s1174_s27, 4294967040  ;;  %s2307_s24 = sld [smem:[#allocation15_spill]]  ;;  %s2308_s26 = sld [smem:[#allocation13_spill]] }
 0x548   : > { %s2309_s23 = sld [smem:[#allocation16_spill]]  ;;  %s2310_s21 = smov %s1628_s22 }
 0x54d   : > { %p26_p8 = scmp.ge.s32.totalorder %s2307_s24, 4   ;;  %s2311_s22 = smov %s2308_s26 }
 0x54f   :  { %28 = sbr.rel (!%p26_p8) target bundleno = 8 (0x8), region = 121 }
 0x556   :  { %1179 = vsyncpa [#allocation4], 1 }
 0x557   :  { %1181 = vsyncpa [#allocation4 + $0x1], 1 }
 0x558   :  { %1182 = vsyncpa [#allocation5], 1 }
 0x559   :  { %1184 = vsyncpa [#allocation5 + $0x1], 1 }
 0x55a   :  { %1185 = vsyncpa [#allocation6], 1 }
 0x55b   :  { %1187 = vsyncpa [#allocation6 + $0x1], 1 }

// kernel: tpu_custom_call.1
= control target key start
LH: loop header
LB: loop body
LE: loop exit
PB: predicated region body
PF: predicated region fallthrough
CT: control target
= control target key end

     0   :  { %s2260_s0 = inlined_call_operand.hbm [shape: f32[2], index: 0, kind: input, shape index: {}]   ;;  %s2261_s1 = inlined_call_operand.hbm [shape: f32[2,16,128], index: 1, kind: input, shape index: {}]   ;;  %s2262_s2 = inlined_call_operand.vmem [shape: f32[2,1,128], index: 2, kind: input, shape index: {}]   ;;  %s2263_s3 = inlined_call_operand.vmem [shape: f32[128,128], index: 3, kind: input, shape index: {}]   ;;  %s2264_s4 = inlined_call_operand.vmem [shape: f32[1,128], index: 4, kind: input, shape index: {}]   ;;  %s2265_s5 = inlined_call_operand.vmem [shape: f32[1,128], index: 5, kind: input, shape index: {}]   ;;  %s2266_s6 = inlined_call_operand.vmem [shape: f32[3,128], index: 6, kind: input, shape index: {}]   ;;  %s2267_s7 = inlined_call_operand.vmem [shape: f32[1,128], index: 7, kind: input, shape index: {}]   ;;  %s2268_s8 = inlined_call_operand.vmem [shape: f32[128,1], index: 8, kind: input, shape index: {}]   ;;  %s2269_s9 = inlined_call_operand.vmem [shape: f32[128,1], index: 9, kind: input, shape index: {}]   ;;  %s2270_s10 = inlined_call_operand.vmem [shape: f32[128,128], index: 10, kind: input, shape index: {}]   ;;  %s2271_s11 = inlined_call_operand.vmem [shape: f32[1,128], index: 11, kind: input, shape index: {}]   ;;  %s2272_s12 = inlined_call_operand.hbm [shape: f32[2,16,128], index: 12, kind: output, shape index: {}]  }
   0x1   :  { %2283 = sst [smem:[#allocation18_spill]] %s2272_s12 }
   0x2   :  { %17 = vsyncpa [#allocation6], 0 }
   0x3   :  { %18 = vsyncpa [#allocation4], 0 }
   0x4   :  { %20 = vsyncpa [#allocation4 + $0x1], 0 }
   0x5   :  { %21 = vsyncpa [#allocation5], 0 }
   0x6   :  { %23 = vsyncpa [#allocation5 + $0x1], 0  ;;  %s1712_s21 = smov 0   ;;  %s1714_s22 = smov 0  }
   0x7   :  { %s1716_s23 = smov 0   ;;  %s1718_s24 = smov 0  }
   0x8 LB: > { %2284 = sst [smem:[#allocation12_spill]] %s1624_s21  ;;  %s1733_s25 = sadd.s32 4294967295, %s1636_s24   ;;  %s1636_s24 = sphi %s1718_s24, %s2307_s24   ;;  %s1632_s23 = sphi %s1716_s23, %s2309_s23   ;;  %s1628_s22 = sphi %s1714_s22, %s2311_s22   ;;  %s1624_s21 = sphi %s1712_s21, %s2310_s21  }
   0x9   : > { %2285 = sst [smem:[#allocation13_spill]] %s1632_s23  ;;  %s1252_s26 = sadd.s32 4294967294, %s1636_s24  }
   0xa   : > { %2286 = sst [smem:[#allocation14_spill]] %s1636_s24  ;;  %s1737_s27 = sadd.s32 1, %s1636_s24  }
   0xb   : > { %2287 = sst [smem:[#allocation15_spill]] %s1737_s27  ;;  %s57_s28 = sadd.s32 1, %s1632_s23 }
   0xc   : > { %s54_s29 = ssub.s32 %s1636_s24, %s1737_s27  ;;  %p64_p0 = scmp.ne.s32.totalorder %s1632_s23, %s1628_s22 }
   0xd   : > { %p55_p1 = scmp.eq.s32.totalorder %s54_s29, 0  ;;  %p65_p2 = scmp.eq.s32.totalorder %s1636_s24, 0 }
   0xe   : > { %p70_p3 = scmp.ne.s32.totalorder %s1628_s22, %s1624_s21  ;;  %p2273_p4 = scmp.eq.s32.totalorder %s1733_s25, 0 }
   0xf   : > { %s1749_s30 = scalar_select %p55_p1, %s1632_s23, %s57_s28  }
  0x10   : > { %p1751_p5 = por %p65_p2, %p64_p0  ;;  %p1757_p6 = por %p2273_p4, %p70_p3 }
  0x11   : > { %2288 = sst [smem:[#allocation16_spill]] %s1749_s30  ;;  %p309_p7 = scmp.eq.s32.totalorder %s1733_s25, 1 }
  0x12   : > { %s2290_s14 = scalar_select %p1757_p6, 1, 0 }
  0x13   : > { %p315_p8 = scmp.eq.s32.totalorder %s1252_s26, 1  ;;  %p1253_p9 = scmp.ge.s32.totalorder %s1636_s24, 1 }
  0x14   : > { %p322_p10 = scmp.lt.s32.totalorder %s1636_s24, 3  ;;  %p1764_p11 = por %p309_p7, %p64_p0 }
  0x15   : > { %p1768_p12 = por %p315_p8, %p70_p3  ;;  %p1475_p4 = scmp.lt.s32.totalorder %s1636_s24, 2 }
  0x16   : > { %s2291_s15 = scalar_select %p1764_p11, 1, 0 }
  0x17   : > { %s2292_s16 = scalar_select %p1768_p12, 1, 0 }
  0x18   : > { %p1772_p13 = pnand %p1253_p9, %p322_p10  ;;  %s371_s18 = sand.u32 1, %s1632_s23  }
  0x19   : > { %2293 = sst [smem:[#allocation17_spill]] %s2292_s16  ;;  %s1270_s19 = sshll.u32 %s1636_s24, 8 }
  0x1a   : > { %p1462_p2 = pneg %p1772_p13  ;;  %p2295_p6 = scmp.eq.s32.totalorder %s1733_s25, 0 }
  0x1b   : > { %p1786_p7 = pnand %p1475_p4, %p1751_p5  ;;  %s1256_s26 = sshll.u32 %s371_s18, 4 }
  0x1c   : > { %p1463_p0 = pnand %p1462_p2, %p2295_p6  ;;  %s1523_s30 = scalar_lea.hbm %s2260_s0, 16 }
  0x1d   : > { %p1524_p3 = scmp.ne.s32.totalorder %s2260_s0, %s1523_s30  ;;  %p1530_p6 = scmp.lt.u32.totalorder %s1523_s30, %s2260_s0 }
  0x1e   : > { %p1525_p8 = pneg %p1463_p0 }
  0x20   : > { %p1526_p9 = pnand %p1525_p8, %p1524_p3 }
  0x22   : > { %p1527_p10 = pneg %p1526_p9 }
  0x24   : > { %p1532_p4 = pnand %p1530_p6, %p1527_p10 }
  0x26   : > { %1535 = shalt.err (!%p1532_p4)
}
  0x27   : > { %s1638_s13 = smov [#allocation3]   ;;  %s1805_s27 = scalar_lea.hbm %s2261_s1, %s1270_s19 }
  0x28   : > { %1465 = dma.hbm_to_smem (!%p1463_p0), %s2260_s0, 16, %s1638_s13, [#allocation6]  }
  0x29   : > { %s375_s23 = scalar_lea.vmem [#allocation7], %s1256_s26  ;;  %s1809_s30 = scalar_lea.sflag [#allocation4], %s371_s18 }
  0x2a   : > { %s382_s24 = sshll.u32 %s375_s23, 4  ;;  %s1536_s16 = scalar_lea.hbm %s1805_s27, 256  ;;  %s1807_s24 = int_to_ptr.vmem [resolvable:$true] %s382_s24 }
  0x2b   : > { %p1537_p5 = scmp.ne.s32.totalorder %s1805_s27, %s1536_s16  ;;  %p1538_p2 = pneg %p1786_p7 }
  0x2c   : > { %s1541_s19 = scalar_lea.hbm %s2261_s1, 512  ;;  %p1542_p8 = scmp.lt.u32.totalorder %s1805_s27, %s2261_s1 }
  0x2d   : > { %p1539_p0 = pnand %p1538_p2, %p1537_p5  ;;  %p1543_p9 = scmp.lt.u32.totalorder %s1541_s19, %s1536_s16 }
  0x2e   : > { %p1545_p6 = scmp.lt.u32.totalorder %s1536_s16, %s1805_s27 }
  0x2f   : > { %p1540_p3 = pneg %p1539_p0  ;;  %p1544_p10 = por %p1543_p9, %p1542_p8 }
  0x31   : > { %p1546_p4 = por %p1545_p6, %p1544_p10 }
  0x33   : > { %p1547_p1 = pnand %p1546_p4, %p1540_p3 }
  0x35   : > { %1550 = shalt.err (!%p1547_p1)
}
  0x36   : > { %s1551_s18 = scalar_lea.vmem %s1807_s24, 256  ;;  %s1639_s26 = smov [#allocation7]  }
  0x37   : > { %p1552_p5 = scmp.ne.s32.totalorder %s1807_s24, %s1551_s18  ;;  %s1556_s29 = sshll.u32 %s1639_s26, 4  ;;  %s1557_s29 = int_to_ptr.vmem [resolvable:$false] %s1556_s29 }
  0x38   : > { %s1558_s23 = scalar_lea.vmem %s1557_s29, 512  ;;  %p1559_p11 = scmp.lt.s32.totalorder %s1807_s24, %s1557_s29 }
  0x39   : > { %p1554_p0 = pnand %p1552_p5, %p1538_p2  ;;  %p1560_p8 = scmp.lt.s32.totalorder %s1558_s23, %s1551_s18 }
  0x3b   : > { %p1555_p12 = pneg %p1554_p0  ;;  %p1561_p9 = por %p1560_p8, %p1559_p11 }
  0x3d   : > { %p1562_p10 = pnand %p1561_p9, %p1555_p12 }
  0x3f   : > { %1565 = shalt.err (!%p1562_p10)
}
  0x40   : > { %s1640_s16 = smov 128   ;;  %s1641_s12 = smov 8  }
  0x41   : > { %1469 = dma.hbm_to_vmem [thread:$0]  (!%p1786_p7), %s1805_s27, 256, %s1807_s24, %s1809_s30, %s1640_s16, %s1640_s16, %s1641_s12  }
  0x42   : > { %400 = sbr.rel (%p1772_p13) target bundleno = 1339 (0x53b), region = 68  ;;  %p2297_p1 = scmp.eq.s32.totalorder (!%p1772_p13), %s1733_s25, 0 }
  0x49   : > { %1611 = dma.done.wait (%p2297_p1), [#allocation6], 16   ;;  %p2298_p2 = pmov %p2297_p1 }
  0x4a   : > { %s1844_s21 = sand.u32 1, %s1628_s22   ;;  %p2299_p11 = scmp.ne.s32.totalorder %s2290_s14, 0 }
  0x4b   : > { %1613 = vsyncadd (%p2298_p2), [#allocation6], 4294967280  ;;  %s1261_s19 = sshll.u32 %s1844_s21, 4  ;;  %s407_s13 = scalar_lea.sflag [#allocation4], %s1844_s21 }
  0x4c   : > { %s1850_s20 = scalar_lea.vmem [#allocation7], %s1261_s19 }
  0x4d   : > { %1615 = dma.done.wait (%p2299_p11), %s407_s13, 256  }
  0x4e   : > { %1617 = vsyncadd (%p2299_p11), %s407_s13, 4294967040 }
  0x4f   : > { %415 = sfence }
  0x50   : > { %v462_v0 = vld [vmem:[%s2263_s3] sm:$0xff]  ;;  %v463_v1 = vld [vmem:[%s2263_s3 + $0x8] sm:$0xff]  ;;  %v464_v2 = vld [vmem:[%s2263_s3 + $0x10] sm:$0xff]  ;;  %p455_p12 = scmp.lt.s32.totalorder %s1733_s25, 1  ;;  %s460_s29 = sld [smem:[#allocation3]]  ;;  %vm613_vm2 = vcmask 1042432   ;;  %v606_v60 = vlaneseq }
  0x51   : > { %v1378_v3 = vpack.c.bf16 %v463_v1, %v462_v0  ;;  %v465_v4 = vld [vmem:[%s2263_s3 + $0x18] sm:$0xff]  ;;  %v466_v6 = vld [vmem:[%s2263_s3 + $0x20] sm:$0xff]  ;;  %v467_v7 = vld [vmem:[%s2263_s3 + $0x28] sm:$0xff]  ;;  %v1642_v62 = vmov 1966171168   ;;  %s454_s23 = scalar_lea.vmem [#allocation8], %s1261_s19 }
  0x52   : > { %v1382_v5 = vpack.c.bf16 %v465_v4, %v464_v2  ;;  %v1386_v8 = vpack.c.bf16 %v467_v7, %v466_v6  ;;  %v1875_v9 = vld [vmem:[%s1850_s20] sm:$0xff]  ;;  %v469_v11 = vld [vmem:[%s2263_s3 + $0x38] sm:$0xff]  ;;  %v471_v14 = vld [vmem:[%s2263_s3 + $0x48] sm:$0xff]  ;;  %s456_s26 = scalar_select %p455_p12, %s1733_s25, 1  ;;  %v670_v63 = vunpack.c.l.s4 %v1642_v62  ;;  %v607_v0 = vshrl.u32 %v606_v60, 7 }
  0x53   : > { %1379 = vmatprep.subr.bf16.mxu0 %v1378_v3  ;;  %v468_v10 = vld [vmem:[%s2263_s3 + $0x30] sm:$0xff]  ;;  %1340 = vmatprep.mubr.f32.mxu0 %v1875_v9  ;;  %v470_v13 = vld [vmem:[%s2263_s3 + $0x40] sm:$0xff]  ;;  %v473_v17 = vld [vmem:[%s2263_s3 + $0x58] sm:$0xff]  ;;  %p2301_p7 = scmp.ne.s32.totalorder %s2291_s15, 0 }
  0x54   : > { %1381 = vmatpush3.bf16.msra.mxu0 %v1378_v3  ;;  %v1390_v12 = vpack.c.bf16 %v469_v11, %v468_v10  ;;  %v1394_v15 = vpack.c.bf16 %v471_v14, %v470_v13  ;;  %v472_v16 = vld [vmem:[%s2263_s3 + $0x50] sm:$0xff]  ;;  %v474_v19 = vld [vmem:[%s2263_s3 + $0x60] sm:$0xff]  ;;  %v475_v20 = vld [vmem:[%s2263_s3 + $0x68] sm:$0xff]  ;;  %s457_s16 = scalar_lea.vmem %s2262_s2, %s456_s26  ;;  %v671_v2 = vunpack.c.0.s8 %v670_v63  ;;  %v1942_v7 = vsub.s32 0, %v607_v0 }
  0x55   : > { %1383 = vmatprep.subr.bf16.mxu0 %v1382_v5  ;;  %v1398_v18 = vpack.c.bf16 %v473_v17, %v472_v16  ;;  %v1402_v21 = vpack.c.bf16 %v475_v20, %v474_v19  ;;  %v476_v22 = vld [vmem:[%s2263_s3 + $0x70] sm:$0xff]  ;;  %v477_v23 = vld [vmem:[%s2263_s3 + $0x78] sm:$0xff]  ;;  %v1264_v26 = vld [vmem:[%s457_s16] ss:$0 sm:$0xff]  ;;  %v625_v17 = vsub.s32 1, %v607_v0  ;;  %vm633_vm3 = vcmp.lt.s32.totalorder %v607_v0, 1 }
  0x56   : > { %v1406_v24 = vpack.c.bf16 %v477_v23, %v476_v22  ;;  %v1909_v25 = vld [vmem:[%s1850_s20 + $0x8] sm:$0xff]  ;;  %v562_v28 = vstv %s460_s29  ;;  %v1934_v56 = vld [vmem:[%s2266_s6] sm:$0x7]  ;;  %v674_v6 = vsub.s32 %v671_v2, %v607_v0  ;;  %vm646_vm4 = vcmp.lt.s32.totalorder %v607_v0, 7  ;;  %s1158_s16 = sshll.u32 %s454_s23, 4  ;;  %s2209_s16 = int_to_ptr.vmem [resolvable:$true] %s1158_s16 }
  0x57   : > { %v614_v57 = vsel %vm613_vm2, %v1934_v56, 0.0  ;;  %v593_v4 = vld [vmem:[%s2264_s4] sm:$0x1] }
  0x58   : > { %1385 = vmatpush3.bf16.msra.mxu0 %v1382_v5  ;;  %v615_v58 = vrot.slane %v614_v57, 4 }
  0x59   : > { %1387 = vmatprep.subr.bf16.mxu0 %v1386_v8 }
  0x5a   : > { %v616_v59 = vadd.f32 %v615_v58, %v614_v57 }
  0x5c   : > { %1389 = vmatpush3.bf16.msra.mxu0 %v1386_v8  ;;  %v617_v61 = vrot.slane %v616_v59, 2 }
  0x5d   : > { %1391 = vmatprep.subr.bf16.mxu0 %v1390_v12 }
  0x5e   : > { %v618_v1 = vadd.f32 %v617_v61, %v616_v59 }
  0x60   : > { %1393 = vmatpush3.bf16.msra.mxu0 %v1390_v12  ;;  %v619_v5 = vrot.slane %v618_v1, 1  ;;  %v600_v12 = vld [vmem:[%s2265_s5] sm:$0x1] }
  0x61   : > { %1395 = vmatprep.subr.bf16.mxu0 %v1394_v15 }
  0x62   : > { %v620_v13 = vadd.f32 %v619_v5, %v618_v1 }
  0x64   : > { %1397 = vmatpush3.bf16.msra.mxu0 %v1394_v15 }
  0x65   : > { %1399 = vmatprep.subr.bf16.mxu0 %v1398_v18 }
  0x68   : > { %1401 = vmatpush3.bf16.msra.mxu0 %v1398_v18  ;;  %v651_v18 = vsub.s32 2, %v607_v0 }
  0x69   : > { %1403 = vmatprep.subr.bf16.mxu0 %v1402_v21 }
  0x6c   : > { %1405 = vmatpush3.bf16.msra.mxu0 %v1402_v21 }
  0x6d   : > { %1407 = vmatprep.subr.bf16.mxu0 %v1406_v24 }
  0x70   : > { %1409 = vmatpush3.bf16.msra.mxu0 %v1406_v24 }
  0x73   : > { %1341 = vmatmul.mubr.f32.vlgmr.msra.gmra.mrb[0].mxu0 %v1909_v25 }
 0x146   : > { %v1342_v27 = vpop.f32.mrb[0].mxu0 }
 0x147   : > { %v557_v29 = vadd.f32 %v1342_v27, %v1264_v26  ;;  %v551_v30 = vpop.f32.mrb[1].mxu0 }
 0x148   : > { %v552_v31 = vadd.f32 %v1264_v26, %v551_v30  ;;  %v612_v26 = vld [vmem:[%s2267_s7] sm:$0x1] }
 0x149   : > { %vm561_vm0 = vcmp.gt.f32.partialorder %v557_v29, 0.0  ;;  %v564_v32 = vmul.f32 %v562_v28, %v557_v29 }
 0x14a   : > { %vm560_vm1 = vcmp.gt.f32.partialorder %v552_v31, 0.0  ;;  %v563_v33 = vmul.f32 %v562_v28, %v552_v31 }
 0x14b   : > { %v1917_v34 = vsel %vm561_vm0, %v557_v29, %v564_v32 }
 0x14c   : > { %v1919_v35 = vsel %vm560_vm1, %v552_v31, %v563_v33  ;;  %v579_v38 = vmul.f32 %v1917_v34, %v1917_v34  ;;  %v668_v3 = vcombine.high %v1917_v34, %v1917_v34  ;;  %v630_v19 = vrot.slane %v1917_v34, 7 }
 0x14d   : > { %v567_v36 = vadd.f32 %v1917_v34, %v1919_v35  ;;  %v578_v37 = vmul.f32 %v1919_v35, %v1919_v35  ;;  %v629_v20 = vrot.slane %v1919_v35, 7  ;;  %v645_v23 = vrot.slane %v1917_v34, 1 }
 0x14e   : > { %v675_v14 = vrot.slane %v668_v3, %v674_v6  ;;  %v644_v24 = vrot.slane %v1919_v35, 1 }
 0x14f   : > { %568 = vadd.xlane.f32.xlu0 %v567_v36  ;;  %v580_v39 = vadd.f32 %v579_v38, %v578_v37  ;;  %v634_v32 = vsel %vm633_vm3, %v629_v20, %v630_v19  ;;  %v635_v33 = vsel %vm633_vm3, %v630_v19, %v629_v20 }
 0x150   : > { %v676_v27 = vcombine.high %v675_v14, %v675_v14 }
 0x153   : > { %581 = vadd.xlane.f32.xlu0 %v580_v39 }
 0x1dc   : > { %v569_v40 = vpop.xlane.xlu0 %568 }
 0x1dd   : > { %v570_v41 = vrot.slane %v569_v40, 4 }
 0x1df   : > { %v571_v42 = vadd.f32 %v570_v41, %v569_v40  ;;  %v647_v40 = vsel %vm646_vm4, %v644_v24, %v645_v23 }
 0x1e0   : > { %v582_v43 = vpop.xlane.xlu0 %581 }
 0x1e1   : > { %v572_v44 = vrot.slane %v571_v42, 2  ;;  %v583_v45 = vrot.slane %v582_v43, 4 }
 0x1e3   : > { %v584_v46 = vadd.f32 %v583_v45, %v582_v43  ;;  %v573_v47 = vadd.f32 %v572_v44, %v571_v42  ;;  %v648_v43 = vsel %vm646_vm4, %v645_v23, %v644_v24 }
 0x1e5   : > { %v585_v48 = vrot.slane %v584_v46, 2  ;;  %v574_v49 = vrot.slane %v573_v47, 1 }
 0x1e7   : > { %v575_v50 = vadd.f32 %v574_v49, %v573_v47  ;;  %v586_v51 = vadd.f32 %v585_v48, %v584_v46  ;;  %v683_v46 = vrot.slane %v676_v27, %v674_v6 }
 0x1e9   : > { %1442 = vpush %v575_v50  ;;  %v587_v52 = vrot.slane %v586_v51, 1 }
 0x1eb   : > { %v588_v53 = vadd.f32 %v587_v52, %v586_v51 }
 0x1ed   : > { %1444 = vpush %v588_v53 }
 0x21a   : > { %s1443_s20 = spop %1442 }
 0x21b   : > { %s1927_s12 = smul.f32 0.001953125, %s1443_s20 }
 0x21d   : > { %s591_s13 = smul.f32 %s1927_s12, %s1927_s12  ;;  %v601_v11 = vstv %s1927_s12 }
 0x21e   : > { %s1445_s17 = spop %1444 }
 0x21f   : > { %s590_s27 = smul.f32 0.001953125, %s1445_s17 }
 0x221   : > { %s592_s24 = ssub.f32 %s590_s27, %s591_s13  ;;  %s1263_s13 = sld [smem:[#allocation3 + $0x1]] }
 0x223   : > { %s594_s30 = sadd.f32 1e-06, %s592_s24 }
 0x225   : > { %v595_v54 = vstv %s594_s30 }
 0x226   : > { %1519 = vrsqrt.f32 %v595_v54 }
 0x227   : > { %v711_v1 = vstv %s1263_s13 }
 0x230   : > { %v1520_v55 = vpop.eup %1519 }
 0x231   : > { %1446 = vpush %v1520_v55 }
 0x262   : > { %s1447_s14 = spop %1446 }
 0x263   : > { %v598_v8 = vstv %s1447_s14 }
 0x264   : > { %v599_v10 = vmul.f32 %v598_v8, %v593_v4 }
 0x266   : > { %v602_v15 = vmul.f32 %v601_v11, %v599_v10  ;;  %v609_v16 = vrot.slane %v599_v10, %v1942_v7  ;;  %v692_v42 = vmul.f32 %v599_v10, %v1919_v35 }
 0x268   : > { %v603_v21 = vsub.f32 %v600_v12, %v602_v15  ;;  %v611_v22 = vmul.f32 %v609_v16, %v1934_v56 }
 0x26a   : > { %v621_v28 = vmul.f32 %v620_v13, %v603_v21  ;;  %v626_v29 = vrot.slane %v611_v22, %v625_v17  ;;  %v639_v30 = vrot.slane %v611_v22, %v1942_v7  ;;  %v652_v31 = vrot.slane %v611_v22, %v651_v18 }
 0x26b   : > { %v693_v49 = vadd.f32 %v692_v42, %v603_v21  ;;  %v745_v42 = vld [vmem:[%s2268_s8 + $0x18] sm:$0xff] }
 0x26c   : > { %v622_v36 = vadd.f32 %v621_v28, %v612_v26  ;;  %v627_v37 = vmul.f32 %v626_v29, %v1919_v35  ;;  %v628_v38 = vmul.f32 %v626_v29, %v1917_v34  ;;  %v640_v39 = vmul.f32 %v639_v30, %v635_v33 }
 0x26d   : > { %v641_v41 = vmul.f32 %v639_v30, %v634_v32  ;;  %v653_v45 = vmul.f32 %v652_v31, %v647_v40  ;;  %v654_v48 = vmul.f32 %v652_v31, %v648_v43  ;;  %v684_v34 = vcombine.high %v683_v46, %v683_v46  ;;  %v743_v31 = vld [vmem:[%s2268_s8 + $0x8] sm:$0xff]  ;;  %v742_v32 = vld [vmem:[%s2268_s8] sm:$0xff]  ;;  %v753_v43 = vld [vmem:[%s2268_s8 + $0x58] sm:$0xff] }
 0x26e   : > { %v642_v44 = vadd.f32 %v640_v39, %v627_v37  ;;  %v661_v51 = vrot.slane %v622_v36, %v1942_v7  ;;  %v698_v55 = vrot.slane %v693_v49, %v1942_v7  ;;  %v751_v39 = vld [vmem:[%s2268_s8 + $0x48] sm:$0xff]  ;;  %v746_v46 = vld [vmem:[%s2268_s8 + $0x20] sm:$0xff] }
 0x26f   : > { %v643_v47 = vadd.f32 %v641_v41, %v628_v38  ;;  %v686_v57 = vmul.f32 %v684_v34, %v599_v10  ;;  %v744_v38 = vld [vmem:[%s2268_s8 + $0x10] sm:$0xff] }
 0x270   : > { %v655_v50 = vadd.f32 %v653_v45, %v642_v44  ;;  %v700_v58 = vmul.f32 %v698_v55, %v1934_v56  ;;  %v748_v55 = vld [vmem:[%s2268_s8 + $0x30] sm:$0xff] }
 0x271   : > { %v656_v52 = vadd.f32 %v654_v48, %v643_v47  ;;  %v687_v35 = vadd.f32 %v686_v57, %v603_v21  ;;  %v1643_v21 = vmov 0   ;;  %v755_v47 = vld [vmem:[%s2268_s8 + $0x68] sm:$0xff] }
 0x272   : > { %v663_v53 = vadd.f32 %v661_v51, %v655_v50  ;;  %v703_v61 = vrot.slane %v700_v58, 2  ;;  %1518 = vset.pattern.permute.xlu1 %v1643_v21  ;;  %1517 = vset.pattern.permute.xlu0 %v1643_v21  ;;  %v747_v50 = vld [vmem:[%s2268_s8 + $0x28] sm:$0xff] }
 0x273   : > { %v664_v54 = vadd.f32 %v661_v51, %v656_v52  ;;  %v688_v59 = vmul.f32 %v687_v35, %v1934_v56  ;;  %v757_v51 = vld [vmem:[%s2268_s8 + $0x78] sm:$0xff]  ;;  %v780_v57 = vld [vmem:[%s2269_s9 + $0x8] sm:$0xff] }
 0x274   : > { %665 = vst [vmem:[#allocation2] sm:$0xff] %v663_v53 }
 0x275   : > { %666 = vst [vmem:[#allocation2 + $0x8] sm:$0xff] %v664_v54 }
 0x27b   : > { %v689_v60 = vld [vmem:[#allocation2] sm:$0x1] }
 0x27c   : > { %v690_v62 = vsub.f32 %v689_v60, %v688_v59  ;;  %v701_v63 = vld [vmem:[#allocation2 + $0xf] sm:$0x1]  ;;  %v749_v60 = vld [vmem:[%s2268_s8 + $0x38] sm:$0xff] }
 0x27d   : > { %v705_v0 = vsub.f32 %v701_v63, %v703_v61  ;;  %v782_v61 = vld [vmem:[%s2269_s9 + $0x18] sm:$0xff] }
 0x27e   : > { %691 = vst [vmem:[#allocation2] sm:$0x1] %v690_v62 }
 0x27f   : > { %706 = vst [vmem:[#allocation2 + $0xf] sm:$0x1] %v705_v0 }
 0x285   : > { %v707_v2 = vld [vmem:[#allocation2] sm:$0xff] }
 0x286   : > { %vm709_vm5 = vcmp.gt.f32.partialorder %v707_v2, 0.0  ;;  %v712_v3 = vmul.f32 %v711_v1, %v707_v2  ;;  %v708_v4 = vld [vmem:[#allocation2 + $0x8] sm:$0xff] }
 0x287   : > { %vm710_vm6 = vcmp.gt.f32.partialorder %v708_v4, 0.0  ;;  %v713_v5 = vmul.f32 %v711_v1, %v708_v4  ;;  %v750_v1 = vld [vmem:[%s2268_s8 + $0x40] sm:$0xff] }
 0x288   : > { %v714_v6 = vsel %vm709_vm5, %v707_v2, %v712_v3  ;;  %v784_v2 = vld [vmem:[%s2269_s9 + $0x28] sm:$0xff] }
 0x289   : > { %1375 = vmatprep.mubr.f32.mxu1 %v714_v6  ;;  %v1967_v8 = vsel %vm710_vm6, %v708_v4, %v713_v5  ;;  %v727_v10 = vmul.f32 %v714_v6, %v714_v6 }
 0x28a   : > { %v716_v56 = vadd.f32 %v1967_v8, %v714_v6  ;;  %v728_v11 = vmul.f32 %v1967_v8, %v1967_v8  ;;  %v752_v6 = vld [vmem:[%s2268_s8 + $0x50] sm:$0xff] }
 0x28c   : > { %717 = vadd.xlane.f32.xlu1 %v716_v56  ;;  %v729_v12 = vadd.f32 %v728_v11, %v727_v10  ;;  %v786_v56 = vld [vmem:[%s2269_s9 + $0x38] sm:$0xff] }
 0x290   : > { %730 = vadd.xlane.f32.xlu1 %v729_v12 }
 0x319   : > { %v718_v13 = vpop.xlane.xlu1 %717 }
 0x31a   : > { %v719_v14 = vrot.slane %v718_v13, 4 }
 0x31c   : > { %v720_v15 = vadd.f32 %v719_v14, %v718_v13  ;;  %v754_v13 = vld [vmem:[%s2268_s8 + $0x60] sm:$0xff]  ;;  %v788_v14 = vld [vmem:[%s2269_s9 + $0x48] sm:$0xff] }
 0x31d   : > { %v731_v16 = vpop.xlane.xlu1 %730 }
 0x31e   : > { %v721_v17 = vrot.slane %v720_v15, 2  ;;  %v732_v18 = vrot.slane %v731_v16, 4 }
 0x320   : > { %v733_v19 = vadd.f32 %v732_v18, %v731_v16  ;;  %v722_v20 = vadd.f32 %v721_v17, %v720_v15  ;;  %v756_v18 = vld [vmem:[%s2268_s8 + $0x70] sm:$0xff] }
 0x322   : > { %v734_v22 = vrot.slane %v733_v19, 2  ;;  %v723_v23 = vrot.slane %v722_v20, 1 }
 0x324   : > { %v724_v24 = vadd.f32 %v723_v23, %v722_v20  ;;  %v735_v26 = vadd.f32 %v734_v22, %v733_v19  ;;  %v790_v19 = vld [vmem:[%s2269_s9 + $0x58] sm:$0xff] }
 0x326   : > { %1448 = vpush %v724_v24  ;;  %v736_v27 = vrot.slane %v735_v26, 1  ;;  %v792_v24 = vld [vmem:[%s2269_s9 + $0x68] sm:$0xff] }
 0x328   : > { %v737_v28 = vadd.f32 %v736_v27, %v735_v26  ;;  %v779_v26 = vld [vmem:[%s2269_s9] sm:$0xff] }
 0x32a   : > { %1450 = vpush %v737_v28 }
 0x357   : > { %s1449_s17 = spop %1448 }
 0x358   : > { %s1972_s27 = smul.f32 0.001953125, %s1449_s17  ;;  %s2300_s17 = sld [smem:[#allocation18_spill]] }
 0x35a   : > { %s740_s24 = smul.f32 %s1972_s27, %s1972_s27  ;;  %v2026_v52 = vstv %s1972_s27 }
 0x35b   : > { %s1451_s30 = spop %1450 }
 0x35c   : > { %s739_s28 = smul.f32 0.001953125, %s1451_s30  ;;  %s1566_s30 = scalar_lea.vmem %s2209_s16, 256 }
 0x35d   : > { %p1567_p13 = scmp.ne.s32.totalorder %s2209_s16, %s1566_s30 }
 0x35e   : > { %s741_s18 = ssub.f32 %s739_s28, %s740_s24  ;;  %s1145_s24 = scalar_lea.sflag [#allocation5], %s1844_s21 }
 0x35f   : > { %p1568_p3 = pnand %p1567_p13, %p2301_p7 }
 0x360   : > { %s758_s26 = sadd.f32 1e-06, %s741_s18 }
 0x361   : > { %p1569_p6 = pneg %p1568_p3 }
 0x362   : > { %v759_v29 = vstv %s758_s26 }
 0x363   : > { %1521 = vrsqrt.f32 %v759_v29 }
 0x36d   : > { %v1522_v30 = vpop.eup %1521 }
 0x36e   : > { %1452 = vpush %v1522_v30 }
 0x39f   : > { %s1453_s20 = spop %1452 }
 0x3a0   : > { %v1982_v33 = vstv %s1453_s20  ;;  %s1271_s20 = sshll.u32 %s1733_s25, 8  ;;  %s1644_s25 = smov [#allocation8]  }
 0x3a1   : > { %v764_v36 = vmul.f32 %v1982_v33, %v743_v31  ;;  %v1986_v37 = vmul.f32 %v1982_v33, %v742_v32  ;;  %v1996_v40 = vmul.f32 %v1982_v33, %v744_v38  ;;  %v772_v41 = vmul.f32 %v1982_v33, %v751_v39  ;;  %v794_v31 = vld [vmem:[%s2269_s9 + $0x78] sm:$0xff]  ;;  %v781_v32 = vld [vmem:[%s2269_s9 + $0x10] sm:$0xff]  ;;  %v783_v38 = vld [vmem:[%s2269_s9 + $0x20] sm:$0xff]  ;;  %s2216_s19 = scalar_lea.hbm %s2300_s17, %s1271_s20  ;;  %s1570_s28 = sshll.u32 %s1644_s25, 4  ;;  %s1571_s28 = int_to_ptr.vmem [resolvable:$false] %s1570_s28 }
 0x3a2   : > { %v766_v44 = vmul.f32 %v1982_v33, %v745_v42  ;;  %v774_v45 = vmul.f32 %v1982_v33, %v753_v43  ;;  %v2015_v48 = vmul.f32 %v1982_v33, %v746_v46  ;;  %v776_v49 = vmul.f32 %v1982_v33, %v755_v47  ;;  %v789_v47 = vld [vmem:[%s2269_s9 + $0x50] sm:$0xff]  ;;  %s1572_s18 = scalar_lea.vmem %s1571_s28, 512  ;;  %p1573_p4 = scmp.lt.s32.totalorder %s2209_s16, %s1571_s28 }
 0x3a3   : > { %851 = vperm.xlu1 %1518, %v764_v36   ;;  %846 = vperm.xlu0 %1517, %v1986_v37   ;;  %v768_v53 = vmul.f32 %v1982_v33, %v747_v50  ;;  %v778_v34 = vmul.f32 %v1982_v33, %v757_v51  ;;  %v797_v54 = vmul.f32 %v2026_v52, %v764_v36  ;;  %v791_v50 = vld [vmem:[%s2269_s9 + $0x60] sm:$0xff]  ;;  %p1574_p5 = scmp.lt.s32.totalorder %s1572_s18, %s1566_s30 }
 0x3a4   : > { %v769_v35 = vmul.f32 %v1982_v33, %v748_v55  ;;  %v799_v59 = vmul.f32 %v2026_v52, %v766_v44  ;;  %v770_v62 = vmul.f32 %v1982_v33, %v749_v60  ;;  %v771_v3 = vmul.f32 %v1982_v33, %v750_v1  ;;  %v2124_v55 = vld [vmem:[%s2270_s10 + $0x8] sm:$0xff] }
 0x3a5   : > { %v813_v58 = vsub.f32 %v780_v57, %v797_v54  ;;  %v801_v0 = vmul.f32 %v2026_v52, %v768_v53  ;;  %v773_v10 = vmul.f32 %v1982_v33, %v752_v6  ;;  %v805_v12 = vmul.f32 %v2026_v52, %v772_v41  ;;  %v2129_v57 = vld [vmem:[%s2270_s10] sm:$0xff]  ;;  %p1575_p0 = por %p1574_p5, %p1573_p4 }
 0x3a6   : > { %v815_v63 = vsub.f32 %v782_v61, %v799_v59  ;;  %v803_v5 = vmul.f32 %v2026_v52, %v770_v62  ;;  %v775_v15 = vmul.f32 %v1982_v33, %v754_v13  ;;  %v807_v17 = vmul.f32 %v2026_v52, %v774_v45 }
 0x3a7   : > { %856 = vperm.xlu1 %1518, %v1996_v40   ;;  %891 = vperm.xlu0 %1517, %v772_v41   ;;  %v817_v4 = vsub.f32 %v784_v2, %v801_v0  ;;  %v821_v16 = vsub.f32 %v788_v14, %v805_v12  ;;  %v777_v20 = vmul.f32 %v1982_v33, %v756_v18  ;;  %v785_v41 = vld [vmem:[%s2269_s9 + $0x30] sm:$0xff]  ;;  %v2141_v0 = vld [vmem:[%s2270_s10 + $0x18] sm:$0xff]  ;;  %p1576_p8 = pnand %p1575_p0, %p1569_p6 }
 0x3a8   : > { %v819_v11 = vsub.f32 %v786_v56, %v803_v5  ;;  %v823_v21 = vsub.f32 %v790_v19, %v807_v17  ;;  %v809_v22 = vmul.f32 %v2026_v52, %v776_v49  ;;  %v796_v23 = vmul.f32 %v2026_v52, %v1986_v37  ;;  %v2148_v56 = vld [vmem:[%s2270_s10 + $0x20] sm:$0xff]  ;;  %v2160_v17 = vld [vmem:[%s2270_s10 + $0x30] sm:$0xff]  ;;  %v835_v18 = vld [vmem:[%s2270_s10 + $0x38] sm:$0xff] }
 0x3a9   : > { %v811_v29 = vmul.f32 %v2026_v52, %v778_v34  ;;  %v798_v30 = vmul.f32 %v2026_v52, %v1996_v40  ;;  %v800_v37 = vmul.f32 %v2026_v52, %v2015_v48  ;;  %v802_v40 = vmul.f32 %v2026_v52, %v769_v35 }
 0x3aa   : > { %v825_v27 = vsub.f32 %v792_v24, %v809_v22  ;;  %v812_v28 = vsub.f32 %v779_v26, %v796_v23  ;;  %v804_v43 = vmul.f32 %v2026_v52, %v771_v3  ;;  %v806_v46 = vmul.f32 %v2026_v52, %v773_v10  ;;  %v2169_v23 = vld [vmem:[%s2270_s10 + $0x48] sm:$0xff]  ;;  %v836_v24 = vld [vmem:[%s2270_s10 + $0x40] sm:$0xff] }
 0x3ab   : > { %861 = vperm.xlu1 %1518, %v766_v44   ;;  %901 = vperm.xlu0 %1517, %v774_v45   ;;  %v827_v33 = vsub.f32 %v794_v31, %v811_v29  ;;  %v814_v36 = vsub.f32 %v781_v32, %v798_v30  ;;  %v816_v39 = vsub.f32 %v783_v38, %v800_v37  ;;  %v787_v44 = vld [vmem:[%s2269_s9 + $0x40] sm:$0xff]  ;;  %v839_v30 = vld [vmem:[%s2270_s10 + $0x58] sm:$0xff]  ;;  %v838_v32 = vld [vmem:[%s2270_s10 + $0x50] sm:$0xff] }
 0x3ac   : > { %v818_v42 = vsub.f32 %v785_v41, %v802_v40  ;;  %v820_v45 = vsub.f32 %v787_v44, %v804_v43  ;;  %v840_v40 = vld [vmem:[%s2270_s10 + $0x60] sm:$0xff] }
 0x3af   : > { %866 = vperm.xlu1 %1518, %v2015_v48   ;;  %911 = vperm.xlu0 %1517, %v776_v49   ;;  %v822_v48 = vsub.f32 %v789_v47, %v806_v46  ;;  %v808_v49 = vmul.f32 %v2026_v52, %v775_v15  ;;  %v843_v46 = vld [vmem:[%s2270_s10 + $0x78] sm:$0xff]  ;;  %v842_v47 = vld [vmem:[%s2270_s10 + $0x70] sm:$0xff] }
 0x3b1   : > { %v824_v51 = vsub.f32 %v791_v50, %v808_v49 }
 0x3b3   : > { %871 = vperm.xlu1 %1518, %v768_v53   ;;  %921 = vperm.xlu0 %1517, %v778_v34   ;;  %v810_v53 = vmul.f32 %v2026_v52, %v777_v20  ;;  %v793_v34 = vld [vmem:[%s2269_s9 + $0x70] sm:$0xff] }
 0x3b5   : > { %v826_v54 = vsub.f32 %v793_v34, %v810_v53 }
 0x3b7   : > { %876 = vperm.xlu1 %1518, %v769_v35   ;;  %948 = vperm.xlu0 %1517, %v813_v58  }
 0x3bb   : > { %881 = vperm.xlu1 %1518, %v770_v62   ;;  %958 = vperm.xlu0 %1517, %v815_v63   ;;  %v2136_v62 = vld [vmem:[%s2270_s10 + $0x10] sm:$0xff] }
 0x3bf   : > { %886 = vperm.xlu1 %1518, %v771_v3   ;;  %968 = vperm.xlu0 %1517, %v817_v4  }
 0x3c3   : > { %896 = vperm.xlu1 %1518, %v773_v10   ;;  %978 = vperm.xlu0 %1517, %v819_v11   ;;  %v2153_v10 = vld [vmem:[%s2270_s10 + $0x28] sm:$0xff] }
 0x3c7   : > { %906 = vperm.xlu1 %1518, %v775_v15   ;;  %988 = vperm.xlu0 %1517, %v821_v16  }
 0x3cb   : > { %916 = vperm.xlu1 %1518, %v777_v20   ;;  %998 = vperm.xlu0 %1517, %v823_v21  }
 0x3cf   : > { %1008 = vperm.xlu0 %1517, %v825_v27   ;;  %943 = vperm.xlu1 %1518, %v812_v28  }
 0x3d3   : > { %1018 = vperm.xlu0 %1517, %v827_v33   ;;  %953 = vperm.xlu1 %1518, %v814_v36  }
 0x3d7   : > { %963 = vperm.xlu1 %1518, %v816_v39   ;;  %v841_v39 = vld [vmem:[%s2270_s10 + $0x68] sm:$0xff] }
 0x3db   : > { %973 = vperm.xlu1 %1518, %v818_v42  }
 0x3df   : > { %983 = vperm.xlu1 %1518, %v820_v45  }
 0x3e3   : > { %993 = vperm.xlu1 %1518, %v822_v48  }
 0x3e7   : > { %1003 = vperm.xlu1 %1518, %v824_v51  }
 0x3eb   : > { %1013 = vperm.xlu1 %1518, %v826_v54  }
 0x422   : > { %v852_v35 = vpop.permute.xlu1 %851  ;;  %v847_v58 = vpop.permute.xlu0 %846 }
 0x423   : > { %v925_v52 = vmul.f32 %v852_v35, %v2124_v55  ;;  %v924_v59 = vmul.f32 %v847_v58, %v2129_v57 }
 0x425   : > { %v1410_v60 = vpack.c.bf16 %v925_v52, %v924_v59 }
 0x426   : > { %v857_v61 = vpop.permute.xlu1 %856  ;;  %v892_v63 = vpop.permute.xlu0 %891 }
 0x427   : > { %1411 = vmatprep.subr.bf16.mxu1 %v1410_v60  ;;  %v926_v2 = vmul.f32 %v857_v61, %v2136_v62  ;;  %v933_v28 = vmul.f32 %v892_v63, %v2169_v23 }
 0x428   : > { %1413 = vmatpush3.bf16.msra.mxu1 %v1410_v60 }
 0x42a   : > { %v862_v1 = vpop.permute.xlu1 %861  ;;  %v902_v5 = vpop.permute.xlu0 %901 }
 0x42b   : > { %v927_v3 = vmul.f32 %v862_v1, %v2141_v0  ;;  %v935_v37 = vmul.f32 %v902_v5, %v839_v30 }
 0x42d   : > { %v1414_v4 = vpack.c.bf16 %v927_v3, %v926_v2 }
 0x42e   : > { %v867_v6 = vpop.permute.xlu1 %866  ;;  %v912_v14 = vpop.permute.xlu0 %911 }
 0x42f   : > { %1415 = vmatprep.subr.bf16.mxu1 %v1414_v4  ;;  %v928_v12 = vmul.f32 %v867_v6, %v2148_v56  ;;  %v937_v44 = vmul.f32 %v912_v14, %v841_v39 }
 0x430   : > { %1417 = vmatpush3.bf16.msra.mxu1 %v1414_v4 }
 0x432   : > { %v872_v11 = vpop.permute.xlu1 %871  ;;  %v922_v19 = vpop.permute.xlu0 %921 }
 0x433   : > { %v929_v13 = vmul.f32 %v872_v11, %v2153_v10  ;;  %v939_v50 = vmul.f32 %v922_v19, %v843_v46 }
 0x435   : > { %v1418_v15 = vpack.c.bf16 %v929_v13, %v928_v12 }
 0x436   : > { %v877_v16 = vpop.permute.xlu1 %876  ;;  %v949_v31 = vpop.permute.xlu0 %948 }
 0x437   : > { %1419 = vmatprep.subr.bf16.mxu1 %v1418_v15  ;;  %v930_v21 = vmul.f32 %v877_v16, %v2160_v17  ;;  %v1022_v35 = vmul.f32 %v949_v31, %v2124_v55 }
 0x438   : > { %1421 = vmatpush3.bf16.msra.mxu1 %v1418_v15 }
 0x43a   : > { %v882_v20 = vpop.permute.xlu1 %881  ;;  %v959_v42 = vpop.permute.xlu0 %958 }
 0x43b   : > { %v931_v22 = vmul.f32 %v882_v20, %v835_v18  ;;  %v1024_v63 = vmul.f32 %v959_v42, %v2141_v0 }
 0x43d   : > { %v1422_v26 = vpack.c.bf16 %v931_v22, %v930_v21 }
 0x43e   : > { %v887_v27 = vpop.permute.xlu1 %886  ;;  %v969_v53 = vpop.permute.xlu0 %968 }
 0x43f   : > { %v932_v29 = vmul.f32 %v887_v27, %v836_v24  ;;  %1423 = vmatprep.subr.bf16.mxu1 %v1422_v26  ;;  %v1026_v55 = vmul.f32 %v969_v53, %v2153_v10 }
 0x440   : > { %1425 = vmatpush3.bf16.msra.mxu1 %v1422_v26 }
 0x441   : > { %v1426_v33 = vpack.c.bf16 %v933_v28, %v932_v29 }
 0x442   : > { %v897_v36 = vpop.permute.xlu1 %896  ;;  %v979_v59 = vpop.permute.xlu0 %978 }
 0x443   : > { %v934_v38 = vmul.f32 %v897_v36, %v838_v32  ;;  %1427 = vmatprep.subr.bf16.mxu1 %v1426_v33  ;;  %v1028_v13 = vmul.f32 %v979_v59, %v835_v18 }
 0x444   : > { %1429 = vmatpush3.bf16.msra.mxu1 %v1426_v33 }
 0x445   : > { %v1430_v41 = vpack.c.bf16 %v935_v37, %v934_v38 }
 0x446   : > { %v907_v43 = vpop.permute.xlu1 %906  ;;  %v989_v5 = vpop.permute.xlu0 %988 }
 0x447   : > { %v936_v45 = vmul.f32 %v907_v43, %v840_v40  ;;  %1431 = vmatprep.subr.bf16.mxu1 %v1430_v41  ;;  %v1030_v0 = vmul.f32 %v989_v5, %v2169_v23 }
 0x448   : > { %1433 = vmatpush3.bf16.msra.mxu1 %v1430_v41 }
 0x449   : > { %v1434_v48 = vpack.c.bf16 %v937_v44, %v936_v45 }
 0x44a   : > { %v917_v49 = vpop.permute.xlu1 %916 }
 0x44b   : > { %v938_v51 = vmul.f32 %v917_v49, %v842_v47  ;;  %1435 = vmatprep.subr.bf16.mxu1 %v1434_v48 }
 0x44c   : > { %1437 = vmatpush3.bf16.msra.mxu1 %v1434_v48 }
 0x44d   : > { %v1438_v34 = vpack.c.bf16 %v939_v50, %v938_v51 }
 0x44e   : > { %v944_v54 = vpop.permute.xlu1 %943 }
 0x44f   : > { %v1021_v58 = vmul.f32 %v944_v54, %v2129_v57  ;;  %1439 = vmatprep.subr.bf16.mxu1 %v1438_v34 }
 0x450   : > { %1441 = vmatpush3.bf16.msra.mxu1 %v1438_v34 }
 0x451   : > { %v1037_v52 = vadd.f32 %v1022_v35, %v1021_v58 }
 0x452   : > { %v954_v60 = vpop.permute.xlu1 %953 }
 0x453   : > { %v1023_v61 = vmul.f32 %v954_v60, %v2136_v62  ;;  %1376 = vmatmul.mubr.f32.vlgmr.msra.gmra.mrb[0].mxu1 %v1967_v8  ;;  %v999_v62 = vpop.permute.xlu0 %998 }
 0x454   : > { %v1032_v26 = vmul.f32 %v999_v62, %v839_v30 }
 0x455   : > { %v1038_v1 = vadd.f32 %v1037_v52, %v1023_v61 }
 0x456   : > { %v964_v2 = vpop.permute.xlu1 %963 }
 0x457   : > { %v1039_v3 = vadd.f32 %v1038_v1, %v1024_v63  ;;  %v1025_v4 = vmul.f32 %v964_v2, %v2148_v56  ;;  %v1009_v22 = vpop.permute.xlu0 %1008 }
 0x458   : > { %v1034_v31 = vmul.f32 %v1009_v22, %v841_v39  ;;  %v940_v39 = vld [vmem:[%s2271_s11] sm:$0x1] }
 0x459   : > { %v1040_v57 = vadd.f32 %v1039_v3, %v1025_v4 }
 0x45a   : > { %v974_v6 = vpop.permute.xlu1 %973 }
 0x45b   : > { %v1041_v11 = vadd.f32 %v1040_v57, %v1026_v55  ;;  %v1027_v12 = vmul.f32 %v974_v6, %v2160_v17  ;;  %v1019_v18 = vpop.permute.xlu0 %1018 }
 0x45d   : > { %v1042_v14 = vadd.f32 %v1041_v11, %v1027_v12 }
 0x45e   : > { %v984_v15 = vpop.permute.xlu1 %983 }
 0x45f   : > { %v1043_v8 = vadd.f32 %v1042_v14, %v1028_v13  ;;  %v1029_v16 = vmul.f32 %v984_v15, %v836_v24  ;;  %v1036_v24 = vmul.f32 %v1019_v18, %v843_v46 }
 0x461   : > { %v1044_v19 = vadd.f32 %v1043_v8, %v1029_v16 }
 0x462   : > { %v994_v20 = vpop.permute.xlu1 %993 }
 0x463   : > { %v1045_v21 = vadd.f32 %v1044_v19, %v1030_v0  ;;  %v1031_v56 = vmul.f32 %v994_v20, %v838_v32 }
 0x465   : > { %v1046_v10 = vadd.f32 %v1045_v21, %v1031_v56 }
 0x466   : > { %v1004_v27 = vpop.permute.xlu1 %1003 }
 0x467   : > { %v1047_v28 = vadd.f32 %v1046_v10, %v1032_v26  ;;  %v1033_v29 = vmul.f32 %v1004_v27, %v840_v40 }
 0x469   : > { %v1048_v17 = vadd.f32 %v1047_v28, %v1033_v29 }
 0x46a   : > { %v1014_v33 = vpop.permute.xlu1 %1013 }
 0x46b   : > { %v1049_v36 = vadd.f32 %v1048_v17, %v1034_v31  ;;  %v1035_v37 = vmul.f32 %v1014_v33, %v842_v47 }
 0x46d   : > { %v1050_v38 = vadd.f32 %v1049_v36, %v1035_v37 }
 0x46f   : > { %v1051_v23 = vadd.f32 %v1050_v38, %v1036_v24 }
 0x471   : > { %v1052_v41 = vrot.slane %v1051_v23, 4 }
 0x473   : > { %v1053_v42 = vadd.f32 %v1052_v41, %v1051_v23 }
 0x475   : > { %v1054_v32 = vrot.slane %v1053_v42, 2 }
 0x477   : > { %v1055_v43 = vadd.f32 %v1054_v32, %v1053_v42 }
 0x479   : > { %v1056_v30 = vrot.slane %v1055_v43, 1 }
 0x47b   : > { %v1057_v44 = vadd.f32 %v1056_v30, %v1055_v43 }
 0x47d   : > { %v1058_v40 = vadd.f32 %v1057_v44, %v940_v39 }
 0x47f   : > { %v1063_v45 = vrot.slane %v1058_v40, %v1942_v7 }
 0x526   : > { %v1377_v46 = vpop.f32.mrb[0].mxu1 }
 0x527   : > { %v1137_v47 = vadd.f32 %v1377_v46, %v1063_v45  ;;  %v1131_v48 = vpop.f32.mrb[1].mxu1 }
 0x528   : > { %v1132_v49 = vadd.f32 %v1131_v48, %v1063_v45 }
 0x529   : > { %v1141_v50 = vadd.f32 %v1137_v47, %v1909_v25 }
 0x52a   : > { %v1140_v51 = vadd.f32 %v1132_v49, %v1875_v9 }
 0x52b   : > { %1143 = vst [vmem:[%s454_s23 + $0x8] sm:$0xff] %v1141_v50 }
 0x52c   : > { %1142 = vst [vmem:[%s454_s23] sm:$0xff] %v1140_v51 }
 0x52d   : > { %1579 = shalt.err (!%p1576_p8)
}
 0x52e   : > { %s1580_s27 = scalar_lea.hbm %s2216_s19, 256  ;;  %s1584_s14 = scalar_lea.hbm %s2300_s17, 512 }
 0x52f   : > { %p1581_p9 = scmp.ne.s32.totalorder %s2216_s19, %s1580_s27  ;;  %p1585_p2 = scmp.lt.u32.totalorder %s2216_s19, %s2300_s17 }
 0x530   : > { %p1586_p11 = scmp.lt.u32.totalorder %s1584_s14, %s1580_s27  ;;  %p1588_p13 = scmp.lt.u32.totalorder %s1580_s27, %s2216_s19 }
 0x531   : > { %p1582_p10 = pnand %p1581_p9, %p2301_p7 }
 0x532   : > { %p1587_p12 = por %p1586_p11, %p1585_p2 }
 0x533   : > { %p1583_p1 = pneg %p1582_p10 }
 0x534   : > { %p1589_p3 = por %p1588_p13, %p1587_p12 }
 0x536   : > { %p1590_p6 = pnand %p1589_p3, %p1583_p1 }
 0x538   : > { %1593 = shalt.err (!%p1590_p6)
}
 0x539   : > { %s1645_s12 = smov 128   ;;  %s1646_s13 = smov 8  }
 0x53a   : > { %1460 = dma.vmem_to_hbm [thread:$0]  (%p2301_p7), %s2209_s16, 256, %s2216_s19, %s1145_s24, %s1645_s12, %s1645_s12, %s1646_s13  }
 0x53b PF: > { %s2302_s30 = sld [smem:[#allocation12_spill]]  ;;  %s2303_s25 = sld [smem:[#allocation17_spill]] }
 0x53c   : > { %s2304_s28 = sld [smem:[#allocation14_spill]] }
 0x541   : > { %s1173_s18 = sand.u32 1, %s2302_s30   ;;  %p2305_p4 = scmp.ne.s32.totalorder %s2303_s25, 0 }
 0x542   : > { %p2306_p5 = scmp.ge.s32.totalorder %s2304_s28, 2  ;;  %s1174_s27 = scalar_lea.sflag [#allocation5], %s1173_s18 }
 0x544   : > { %p1471_p0 = pnand %p2306_p5, %p2305_p4 }
 0x546   : > { %1619 = dma.done.wait (!%p1471_p0), %s1174_s27, 256  }
 0x547   : > { %1621 = vsyncadd (!%p1471_p0), %s1174_s27, 4294967040  ;;  %s2307_s24 = sld [smem:[#allocation15_spill]]  ;;  %s2308_s26 = sld [smem:[#allocation13_spill]] }
 0x548   : > { %s2309_s23 = sld [smem:[#allocation16_spill]]  ;;  %s2310_s21 = smov %s1628_s22 }
 0x54d   : > { %p26_p8 = scmp.ge.s32.totalorder %s2307_s24, 4   ;;  %s2311_s22 = smov %s2308_s26 }
 0x54f   :  { %28 = sbr.rel (!%p26_p8) target bundleno = 8 (0x8), region = 121 }
 0x556   :  { %1179 = vsyncpa [#allocation4], 1 }
 0x557   :  { %1181 = vsyncpa [#allocation4 + $0x1], 1 }
 0x558   :  { %1182 = vsyncpa [#allocation5], 1 }
 0x559   :  { %1184 = vsyncpa [#allocation5 + $0x1], 1 }
 0x55a   :  { %1185 = vsyncpa [#allocation6], 1 }
 0x55b   :  { %1187 = vsyncpa [#allocation6 + $0x1], 1 }

</bundles_post_ra>
